<compile_context>
chip_gen: v6e
topology: v6e:2x2x1
jax: 0.10.0
libtpu: 0.0.40
codegen_flags: <defaults>
</compile_context>

<pallas_src>
import functools

import jax
import jax.numpy as jnp
import numpy as np
from jax.experimental import pallas as pl
from jax.experimental.pallas import tpu as pltpu


def _round_up(x, m):
    return (x + m - 1) // m * m


def _coupling_kernel(point_ref, cm_ref,
                     wp_ref, bp_ref,
                     w1c_ref, w1p_ref, b1_ref,
                     w2s_ref, b2s_ref, w3s_ref, b3s_ref,
                     w2t_ref, b2t_ref, w3t_ref, b3t_ref,
                     out_ref, *, split, inv, hidden):
    # point_ref/out_ref: (n_chunk, T, 3) f32;  cm_ref: (T, F) bf16.
    H = hidden
    n_chunk, T, _ = point_ref.shape

    # ---- N-invariant work (amortized over the n_chunk inner iterations) ----
    # Cm contribution to the fused first layer (bf16 MXU, f32 accumulate).
    cm1 = jnp.dot(cm_ref[...], w1c_ref[...],
                  preferred_element_type=jnp.float32)            # (T, 2H) f32

    wp = wp_ref[...]                                             # (3, P) f32
    P = wp.shape[1]
    # Hoist broadcasts / slices out of the unrolled n loop (no CSE of
    # broadcast_in_dim in JAX).
    bp_b = jnp.broadcast_to(bp_ref[...], (T, P))                 # (T, P)
    wp_rows = [wp[d:d + 1, :] for d in range(3)]
    w1p = w1p_ref[...]
    b1 = b1_ref[...]
    w2s = w2s_ref[...]; b2s = b2s_ref[...]
    w3s = w3s_ref[...]; b3s = b3s_ref[...]
    w2t = w2t_ref[...]; b2t = b2t_ref[...]
    w3t = w3t_ref[...]; b3t = b3t_ref[...]
    col = jax.lax.broadcasted_iota(jnp.int32, (1, 3), 1)         # (1, 3)

    # n_chunk is small and static -> Python unroll (full LLO visibility).
    for n in range(n_chunk):
        pt = point_ref[n]                                        # (T, 3) f32

        # p_theta: Linear(3 -> P) + ReLU on the masked point.  K = 3 is far
        # too small for the MXU; do 2 broadcast-FMAs on the VPU.  The `split`
        # coordinate is masked to zero in PyTorch, so its term is skipped.
        p = bp_b
        for d in range(3):
            if d != split:
                p = p + pt[:, d:d + 1] * wp_rows[d]
        p = jnp.maximum(p, 0.0)                                  # (T, P)

        x_split = pt[:, split:split + 1]                         # (T, 1)

        # Fused layer 1 (columns [0:H] = S branch, [H:2H] = T branch).
        h1 = jnp.maximum(
            cm1
            + jnp.dot(p.astype(jnp.bfloat16), w1p,
                      preferred_element_type=jnp.float32)
            + b1, 0.0).astype(jnp.bfloat16)                      # (T, 2H)

        # Layers 2/3 per branch -> no block-diagonal zero MACs on the MXU.
        h2s = jnp.maximum(
            jnp.dot(h1[:, :H], w2s, preferred_element_type=jnp.float32) + b2s,
            0.0).astype(jnp.bfloat16)
        h2t = jnp.maximum(
            jnp.dot(h1[:, H:], w2t, preferred_element_type=jnp.float32) + b2t,
            0.0).astype(jnp.bfloat16)
        s = jnp.dot(h2s, w3s, preferred_element_type=jnp.float32) + b3s
        s = jnp.clip(s, -10.0, 10.0)                             # Hardtanh(-10, 10)
        t = jnp.dot(h2t, w3t, preferred_element_type=jnp.float32) + b3t

        if inv:   # backward_sub
            new_split = (x_split - t) * jnp.exp(-s)
        else:     # forward_sub
            new_split = t + x_split * jnp.exp(s)

        # result = point with its `split` column replaced by new_split.
        # Single full-block store; no mask arithmetic, no captured constants.
        out_ref[n] = jnp.where(col == split, new_split, pt)


def _pack_params(params):
    """Pack weights for the kernel.

    Layer 1 of the S/T MLPs is fused densely (W1 = [w1s | w1t], no zero
    blocks); layers 2/3 stay per-branch.  All MXU operands are cast to
    bfloat16 (the kernel accumulates in f32); biases and the tiny p_theta
    weights stay f32 (VPU side).
    """
    bf16, f32 = jnp.bfloat16, jnp.float32
    w1c = jnp.concatenate([params["w1s_c"], params["w1t_c"]], axis=1).astype(bf16)  # (F, 2H)
    w1p = jnp.concatenate([params["w1s_p"], params["w1t_p"]], axis=1).astype(bf16)  # (P, 2H)
    b1 = jnp.concatenate([params["b1s"], params["b1t"]], axis=1).astype(f32)        # (1, 2H)
    return (params["wp"].astype(f32), params["bp"].astype(f32),
            w1c, w1p, b1,
            params["w2s"].astype(bf16), params["b2s"].astype(f32),
            params["w3s"].astype(bf16), params["b3s"].astype(f32),
            params["w2t"].astype(bf16), params["b2t"].astype(f32),
            params["w3t"].astype(bf16), params["b3t"].astype(f32))


def conditional_coupling_forward(Cm, point, params, *, split, inv,
                                 tile_r=2048, n_chunk=8):
    B, N, M, D = point.shape
    assert D == 3
    F = Cm.shape[-1]
    H = params["w2s"].shape[0]
    R = B * M                                   # one Cm row per (b, m) token

    # Rows ordered (b, m) so they match Cm exactly: the N-fold Cm broadcast of
    # the PyTorch code never materializes in HBM.
    pts = jnp.transpose(point.astype(jnp.float32), (1, 0, 2, 3)).reshape(N, R, 3)
    cm = Cm.reshape(R, F).astype(jnp.bfloat16)   # MXU operand -> bf16 (halves HBM too)

    # Row tiling: big tiles amortize per-grid-step overhead.  Granularity 16
    # satisfies native sublane tiling for both f32 and bf16 blocks.  Keep >= 2
    # row tiles when R allows so the "parallel" axis can shard across both
    # TensorCores on v7x.
    tile_r = max(16, min(_round_up(tile_r, 16), _round_up(R, 16)))
    if R > 16:
        tile_r = min(tile_r, _round_up((R + 1) // 2, 16))
    R_pad = _round_up(R, tile_r)

    # Fold (a chunk of) N into the kernel body.
    n_chunk = max(1, min(n_chunk, N))
    N_pad = _round_up(N, n_chunk)

    if R_pad != R or N_pad != N:
        pts = jnp.pad(pts, ((0, N_pad - N), (0, R_pad - R), (0, 0)))
    if R_pad != R:
        cm = jnp.pad(cm, ((0, R_pad - R), (0, 0)))

    weights = _pack_params(params)

    kernel = functools.partial(_coupling_kernel, split=split, inv=inv, hidden=H)
    out = pl.pallas_call(
        kernel,
        out_shape=jax.ShapeDtypeStruct((N_pad, R_pad, 3), jnp.float32),
        grid=(R_pad // tile_r, N_pad // n_chunk),
        in_specs=[pl.BlockSpec((n_chunk, tile_r, 3), lambda i, j: (j, i, 0)),
                  # Cm index_map ignores the inner N axis -> tile stays
                  # VMEM-resident across all N steps of a row tile.
                  pl.BlockSpec((tile_r, F), lambda i, j: (i, 0))]
                 + [pl.BlockSpec(w.shape, lambda i, j: (0, 0)) for w in weights],
        out_specs=pl.BlockSpec((n_chunk, tile_r, 3), lambda i, j: (j, i, 0)),
        compiler_params=pltpu.CompilerParams(
            dimension_semantics=("parallel", "arbitrary"),
            # Headroom-safe on v7x's 64 MiB VMEM; plenty for v5e/v6e.
            vmem_limit_bytes=48 * 1024 * 1024),
    )(pts, cm, *weights)

    out = out[:N, :R, :].reshape(N, B, M, 3)
    return jnp.transpose(out, (1, 0, 2, 3))


def init_params(key, n_feature, n_p_theta, hidden):
    """Deterministic PyTorch-Linear-style init (uniform +-1/sqrt(fan_in))."""
    ks = jax.random.split(key, 7)

    def lin(k, fan_in, fan_out):
        bound = 1.0 / float(np.sqrt(fan_in))
        kw, kb = jax.random.split(k)
        w = jax.random.uniform(kw, (fan_in, fan_out), jnp.float32, -bound, bound)
        b = jax.random.uniform(kb, (1, fan_out), jnp.float32, -bound, bound)
        return w, b

    wp, bp = lin(ks[0], 3, n_p_theta)
    din = n_feature + n_p_theta
    w1s, b1s = lin(ks[1], din, hidden)
    w2s, b2s = lin(ks[2], hidden, hidden)
    w3s, b3s = lin(ks[3], hidden, 1)
    w1t, b1t = lin(ks[4], din, hidden)
    w2t, b2t = lin(ks[5], hidden, hidden)
    w3t, b3t = lin(ks[6], hidden, 1)
    return dict(
        wp=wp, bp=bp,
        w1s_c=w1s[:n_feature], w1s_p=w1s[n_feature:], b1s=b1s,
        w2s=w2s, b2s=b2s, w3s=w3s, b3s=b3s,
        w1t_c=w1t[:n_feature], w1t_p=w1t[n_feature:], b1t=b1t,
        w2t=w2t, b2t=b2t, w3t=w3t, b3t=b3t)


def reference_forward(Cm, point, params, *, split, inv):
    """Pure-JAX f32 reference mirroring the PyTorch forward pass."""
    B, N, M, D = point.shape
    nsplit = jnp.ones((3,), jnp.float32).at[split].set(0.0).reshape(1, 1, 1, 3)
    pn = nsplit * point
    x_split = ((1.0 - nsplit) * point)[..., split:split + 1]

    p = jnp.maximum(pn @ params["wp"] + params["bp"].reshape(-1), 0.0)
    cm_ext = jnp.broadcast_to(Cm[:, None, :, :], (B, N, M, Cm.shape[-1]))
    x = jnp.concatenate([cm_ext, p], axis=-1)

    w1s = jnp.concatenate([params["w1s_c"], params["w1s_p"]], axis=0)
    h1 = jnp.maximum(x @ w1s + params["b1s"].reshape(-1), 0.0)
    h2 = jnp.maximum(h1 @ params["w2s"] + params["b2s"].reshape(-1), 0.0)
    s = jnp.clip(h2 @ params["w3s"] + params["b3s"].reshape(-1), -10.0, 10.0)

    w1t = jnp.concatenate([params["w1t_c"], params["w1t_p"]], axis=0)
    g1 = jnp.maximum(x @ w1t + params["b1t"].reshape(-1), 0.0)
    g2 = jnp.maximum(g1 @ params["w2t"] + params["b2t"].reshape(-1), 0.0)
    t = g2 @ params["w3t"] + params["b3t"].reshape(-1)

    new_split = (x_split - t) * jnp.exp(-s) if inv else t + x_split * jnp.exp(s)
    return pn + (1.0 - nsplit) * new_split


if __name__ == "__main__":
    B, N, M = 2, 4, 8
    n_feature, n_p_theta, hidden = 16, 8, 32
    split = 1

    key = jax.random.PRNGKey(0)
    k_cm, k_pt, k_params = jax.random.split(key, 3)
    Cm = jax.random.normal(k_cm, (B, M, n_feature), jnp.float32)
    point = jax.random.normal(k_pt, (B, N, M, 3), jnp.float32)
    params = init_params(k_params, n_feature, n_p_theta, hidden)

    for inv in (False, True):
        out = conditional_coupling_forward(Cm, point, params, split=split, inv=inv)
        out = jax.block_until_ready(out)
        assert out.shape == (B, N, M, 3)
        ref = reference_forward(Cm, point, params, split=split, inv=inv)
        # bf16 MXU matmuls vs. the f32 reference -> relaxed tolerance.
        np.testing.assert_allclose(np.asarray(out), np.asarray(ref),
                                   rtol=2e-2, atol=2e-2)

    print("KERNEL_OK")
</pallas_src>

<mosaic_0001>
module attributes {stable_mosaic.version = 11 : i64} {
  func.func @_coupling_kernel(%arg0: i32, %arg1: i32, %arg2: memref<4x16x3xf32, #tpu.memory_space<vmem>>, %arg3: memref<16x16xbf16, #tpu.memory_space<vmem>>, %arg4: memref<3x8xf32, #tpu.memory_space<vmem>>, %arg5: memref<1x8xf32, #tpu.memory_space<vmem>>, %arg6: memref<16x64xbf16, #tpu.memory_space<vmem>>, %arg7: memref<8x64xbf16, #tpu.memory_space<vmem>>, %arg8: memref<1x64xf32, #tpu.memory_space<vmem>>, %arg9: memref<32x32xbf16, #tpu.memory_space<vmem>>, %arg10: memref<1x32xf32, #tpu.memory_space<vmem>>, %arg11: memref<32x1xbf16, #tpu.memory_space<vmem>>, %arg12: memref<1x1xf32, #tpu.memory_space<vmem>>, %arg13: memref<32x32xbf16, #tpu.memory_space<vmem>>, %arg14: memref<1x32xf32, #tpu.memory_space<vmem>>, %arg15: memref<32x1xbf16, #tpu.memory_space<vmem>>, %arg16: memref<1x1xf32, #tpu.memory_space<vmem>>, %arg17: memref<4x16x3xf32, #tpu.memory_space<vmem>>) attributes {dimension_semantics = [#tpu.dimension_semantics<parallel>, #tpu.dimension_semantics<arbitrary>], iteration_bounds = array<i64: 1, 1>, scalar_prefetch = 0 : i64, scratch_operands = 0 : i64, tpu.core_type = #tpu.core_type<tc>, window_params = [{transform_indices = @transform_0, window_bounds = array<i64: 4, 16, 3>}, {transform_indices = @transform_1, window_bounds = array<i64: 16, 16>}, {pipeline_mode = #tpu.pipeline_mode<synchronous>, transform_indices = @transform_2, window_bounds = array<i64: 3, 8>}, {pipeline_mode = #tpu.pipeline_mode<synchronous>, transform_indices = @transform_3, window_bounds = array<i64: 1, 8>}, {pipeline_mode = #tpu.pipeline_mode<synchronous>, transform_indices = @transform_4, window_bounds = array<i64: 16, 64>}, {pipeline_mode = #tpu.pipeline_mode<synchronous>, transform_indices = @transform_5, window_bounds = array<i64: 8, 64>}, {pipeline_mode = #tpu.pipeline_mode<synchronous>, transform_indices = @transform_6, window_bounds = array<i64: 1, 64>}, {pipeline_mode = #tpu.pipeline_mode<synchronous>, transform_indices = @transform_7, window_bounds = array<i64: 32, 32>}, {pipeline_mode = #tpu.pipeline_mode<synchronous>, transform_indices = @transform_8, window_bounds = array<i64: 1, 32>}, {pipeline_mode = #tpu.pipeline_mode<synchronous>, transform_indices = @transform_9, window_bounds = array<i64: 32, 1>}, {pipeline_mode = #tpu.pipeline_mode<synchronous>, transform_indices = @transform_10, window_bounds = array<i64: 1, 1>}, {pipeline_mode = #tpu.pipeline_mode<synchronous>, transform_indices = @transform_11, window_bounds = array<i64: 32, 32>}, {pipeline_mode = #tpu.pipeline_mode<synchronous>, transform_indices = @transform_12, window_bounds = array<i64: 1, 32>}, {pipeline_mode = #tpu.pipeline_mode<synchronous>, transform_indices = @transform_13, window_bounds = array<i64: 32, 1>}, {pipeline_mode = #tpu.pipeline_mode<synchronous>, transform_indices = @transform_14, window_bounds = array<i64: 1, 1>}, {transform_indices = @transform_15, window_bounds = array<i64: 4, 16, 3>}]} {
    %c0 = arith.constant 0 : index
    %c0_0 = arith.constant 0 : index
    %0 = vector.load %arg3[%c0, %c0_0] : memref<16x16xbf16, #tpu.memory_space<vmem>>, vector<16x16xbf16>
    %c0_1 = arith.constant 0 : index
    %c0_2 = arith.constant 0 : index
    %1 = vector.load %arg6[%c0_1, %c0_2] : memref<16x64xbf16, #tpu.memory_space<vmem>>, vector<16x64xbf16>
    %cst = arith.constant dense<0.000000e+00> : vector<16x64xf32>
    %2 = tpu.matmul %0, %1, %cst {dimension_numbers = #tpu.dot_dimension_numbers<[1], [0], [0], [1], [0, 0, 1, 1], [], []>} : vector<16x16xbf16>, vector<16x64xbf16>, vector<16x64xf32> -> vector<16x64xf32>
    %c0_3 = arith.constant 0 : index
    %c0_4 = arith.constant 0 : index
    %3 = vector.load %arg4[%c0_3, %c0_4] : memref<3x8xf32, #tpu.memory_space<vmem>>, vector<3x8xf32>
    %c0_5 = arith.constant 0 : index
    %c0_6 = arith.constant 0 : index
    %4 = vector.load %arg5[%c0_5, %c0_6] : memref<1x8xf32, #tpu.memory_space<vmem>>, vector<1x8xf32>
    %5 = vector.shape_cast %4 : vector<1x8xf32> to vector<1x8xf32>
    %6 = vector.broadcast %5 : vector<1x8xf32> to vector<16x8xf32>
    %7 = vector.extract_strided_slice %3 {offsets = [0, 0], sizes = [1, 8], strides = [1, 1]} : vector<3x8xf32> to vector<1x8xf32>
    %8 = vector.extract_strided_slice %3 {offsets = [2, 0], sizes = [1, 8], strides = [1, 1]} : vector<3x8xf32> to vector<1x8xf32>
    %c0_7 = arith.constant 0 : index
    %c0_8 = arith.constant 0 : index
    %9 = vector.load %arg7[%c0_7, %c0_8] : memref<8x64xbf16, #tpu.memory_space<vmem>>, vector<8x64xbf16>
    %c0_9 = arith.constant 0 : index
    %c0_10 = arith.constant 0 : index
    %10 = vector.load %arg8[%c0_9, %c0_10] : memref<1x64xf32, #tpu.memory_space<vmem>>, vector<1x64xf32>
    %c0_11 = arith.constant 0 : index
    %c0_12 = arith.constant 0 : index
    %11 = vector.load %arg9[%c0_11, %c0_12] : memref<32x32xbf16, #tpu.memory_space<vmem>>, vector<32x32xbf16>
    %c0_13 = arith.constant 0 : index
    %c0_14 = arith.constant 0 : index
    %12 = vector.load %arg10[%c0_13, %c0_14] : memref<1x32xf32, #tpu.memory_space<vmem>>, vector<1x32xf32>
    %c0_15 = arith.constant 0 : index
    %c0_16 = arith.constant 0 : index
    %13 = vector.load %arg11[%c0_15, %c0_16] : memref<32x1xbf16, #tpu.memory_space<vmem>>, vector<32x1xbf16>
    %c0_17 = arith.constant 0 : index
    %c0_18 = arith.constant 0 : index
    %14 = vector.load %arg12[%c0_17, %c0_18] : memref<1x1xf32, #tpu.memory_space<vmem>>, vector<1x1xf32>
    %c0_19 = arith.constant 0 : index
    %c0_20 = arith.constant 0 : index
    %15 = vector.load %arg13[%c0_19, %c0_20] : memref<32x32xbf16, #tpu.memory_space<vmem>>, vector<32x32xbf16>
    %c0_21 = arith.constant 0 : index
    %c0_22 = arith.constant 0 : index
    %16 = vector.load %arg14[%c0_21, %c0_22] : memref<1x32xf32, #tpu.memory_space<vmem>>, vector<1x32xf32>
    %c0_23 = arith.constant 0 : index
    %c0_24 = arith.constant 0 : index
    %17 = vector.load %arg15[%c0_23, %c0_24] : memref<32x1xbf16, #tpu.memory_space<vmem>>, vector<32x1xbf16>
    %c0_25 = arith.constant 0 : index
    %c0_26 = arith.constant 0 : index
    %18 = vector.load %arg16[%c0_25, %c0_26] : memref<1x1xf32, #tpu.memory_space<vmem>>, vector<1x1xf32>
    %19 = tpu.iota {dimensions = array<i32: 1>} : vector<1x3xi32>
    %c0_27 = arith.constant 0 : index
    %c0_28 = arith.constant 0 : index
    %c0_29 = arith.constant 0 : index
    %20 = vector.load %arg2[%c0_27, %c0_28, %c0_29] : memref<4x16x3xf32, #tpu.memory_space<vmem>>, vector<1x16x3xf32>
    %21 = vector.shape_cast %20 : vector<1x16x3xf32> to vector<16x3xf32>
    %22 = vector.extract_strided_slice %21 {offsets = [0, 0], sizes = [16, 1], strides = [1, 1]} : vector<16x3xf32> to vector<16x1xf32>
    %23 = vector.broadcast %22 : vector<16x1xf32> to vector<16x8xf32>
    %24 = vector.broadcast %7 : vector<1x8xf32> to vector<16x8xf32>
    %25 = arith.mulf %23, %24 : vector<16x8xf32>
    %26 = arith.addf %6, %25 : vector<16x8xf32>
    %27 = vector.extract_strided_slice %21 {offsets = [0, 2], sizes = [16, 1], strides = [1, 1]} : vector<16x3xf32> to vector<16x1xf32>
    %28 = vector.broadcast %27 : vector<16x1xf32> to vector<16x8xf32>
    %29 = vector.broadcast %8 : vector<1x8xf32> to vector<16x8xf32>
    %30 = arith.mulf %28, %29 : vector<16x8xf32>
    %31 = arith.addf %26, %30 : vector<16x8xf32>
    %cst_30 = arith.constant 0.000000e+00 : f32
    %32 = vector.broadcast %cst_30 : f32 to vector<16x8xf32>
    %33 = arith.maximumf %31, %32 : vector<16x8xf32>
    %34 = vector.extract_strided_slice %21 {offsets = [0, 1], sizes = [16, 1], strides = [1, 1]} : vector<16x3xf32> to vector<16x1xf32>
    %35 = arith.truncf %33 : vector<16x8xf32> to vector<16x8xbf16>
    %cst_31 = arith.constant dense<0.000000e+00> : vector<16x64xf32>
    %36 = tpu.matmul %35, %9, %cst_31 {dimension_numbers = #tpu.dot_dimension_numbers<[1], [0], [0], [1], [0, 0, 1, 1], [], []>} : vector<16x8xbf16>, vector<8x64xbf16>, vector<16x64xf32> -> vector<16x64xf32>
    %37 = arith.addf %2, %36 : vector<16x64xf32>
    %38 = vector.broadcast %10 : vector<1x64xf32> to vector<16x64xf32>
    %39 = arith.addf %37, %38 : vector<16x64xf32>
    %cst_32 = arith.constant 0.000000e+00 : f32
    %40 = vector.broadcast %cst_32 : f32 to vector<16x64xf32>
    %41 = arith.maximumf %39, %40 : vector<16x64xf32>
    %42 = arith.truncf %41 : vector<16x64xf32> to vector<16x64xbf16>
    %43 = vector.extract_strided_slice %42 {offsets = [0, 0], sizes = [16, 32], strides = [1, 1]} : vector<16x64xbf16> to vector<16x32xbf16>
    %cst_33 = arith.constant dense<0.000000e+00> : vector<16x32xf32>
    %44 = tpu.matmul %43, %11, %cst_33 {dimension_numbers = #tpu.dot_dimension_numbers<[1], [0], [0], [1], [0, 0, 1, 1], [], []>} : vector<16x32xbf16>, vector<32x32xbf16>, vector<16x32xf32> -> vector<16x32xf32>
    %45 = vector.broadcast %12 : vector<1x32xf32> to vector<16x32xf32>
    %46 = arith.addf %44, %45 : vector<16x32xf32>
    %cst_34 = arith.constant 0.000000e+00 : f32
    %47 = vector.broadcast %cst_34 : f32 to vector<16x32xf32>
    %48 = arith.maximumf %46, %47 : vector<16x32xf32>
    %49 = arith.truncf %48 : vector<16x32xf32> to vector<16x32xbf16>
    %50 = vector.extract_strided_slice %42 {offsets = [0, 32], sizes = [16, 32], strides = [1, 1]} : vector<16x64xbf16> to vector<16x32xbf16>
    %cst_35 = arith.constant dense<0.000000e+00> : vector<16x32xf32>
    %51 = tpu.matmul %50, %15, %cst_35 {dimension_numbers = #tpu.dot_dimension_numbers<[1], [0], [0], [1], [0, 0, 1, 1], [], []>} : vector<16x32xbf16>, vector<32x32xbf16>, vector<16x32xf32> -> vector<16x32xf32>
    %52 = vector.broadcast %16 : vector<1x32xf32> to vector<16x32xf32>
    %53 = arith.addf %51, %52 : vector<16x32xf32>
    %cst_36 = arith.constant 0.000000e+00 : f32
    %54 = vector.broadcast %cst_36 : f32 to vector<16x32xf32>
    %55 = arith.maximumf %53, %54 : vector<16x32xf32>
    %56 = arith.truncf %55 : vector<16x32xf32> to vector<16x32xbf16>
    %cst_37 = arith.constant dense<0.000000e+00> : vector<16x1xf32>
    %57 = tpu.matmul %49, %13, %cst_37 {dimension_numbers = #tpu.dot_dimension_numbers<[1], [0], [0], [1], [0, 0, 1, 1], [], []>} : vector<16x32xbf16>, vector<32x1xbf16>, vector<16x1xf32> -> vector<16x1xf32>
    %58 = vector.broadcast %14 : vector<1x1xf32> to vector<16x1xf32>
    %59 = arith.addf %57, %58 : vector<16x1xf32>
    %cst_38 = arith.constant -1.000000e+01 : f32
    %cst_39 = arith.constant 1.000000e+01 : f32
    %60 = vector.broadcast %cst_38 : f32 to vector<16x1xf32>
    %61 = arith.maximumf %60, %59 : vector<16x1xf32>
    %62 = vector.broadcast %cst_39 : f32 to vector<16x1xf32>
    %63 = arith.minimumf %62, %61 : vector<16x1xf32>
    %cst_40 = arith.constant dense<0.000000e+00> : vector<16x1xf32>
    %64 = tpu.matmul %56, %17, %cst_40 {dimension_numbers = #tpu.dot_dimension_numbers<[1], [0], [0], [1], [0, 0, 1, 1], [], []>} : vector<16x32xbf16>, vector<32x1xbf16>, vector<16x1xf32> -> vector<16x1xf32>
    %65 = vector.broadcast %18 : vector<1x1xf32> to vector<16x1xf32>
    %66 = arith.addf %64, %65 : vector<16x1xf32>
    %67 = math.exp %63 : vector<16x1xf32>
    %68 = arith.mulf %34, %67 : vector<16x1xf32>
    %69 = arith.addf %66, %68 : vector<16x1xf32>
    %c1_i32 = arith.constant 1 : i32
    %70 = vector.broadcast %c1_i32 : i32 to vector<1x3xi32>
    %71 = arith.cmpi eq, %19, %70 : vector<1x3xi32>
    %72 = vector.shape_cast %71 : vector<1x3xi1> to vector<1x3xi1>
    %73 = vector.broadcast %72 : vector<1x3xi1> to vector<16x3xi1>
    %74 = vector.shape_cast %69 : vector<16x1xf32> to vector<16x1xf32>
    %75 = vector.broadcast %74 : vector<16x1xf32> to vector<16x3xf32>
    %76 = arith.select %73, %75, %21 : vector<16x3xi1>, vector<16x3xf32>
    %c0_41 = arith.constant 0 : index
    %c0_42 = arith.constant 0 : index
    %c0_43 = arith.constant 0 : index
    %77 = vector.load %arg17[%c0_41, %c0_42, %c0_43] : memref<4x16x3xf32, #tpu.memory_space<vmem>>, vector<1x16x3xf32>
    %78 = vector.shape_cast %77 : vector<1x16x3xf32> to vector<16x3xf32>
    %79 = vector.shape_cast %76 : vector<16x3xf32> to vector<1x16x3xf32>
    tpu.vector_store %arg17[%c0_41, %c0_42, %c0_43], %79 {strides = array<i32>} : memref<4x16x3xf32, #tpu.memory_space<vmem>>, vector<1x16x3xf32>,
    %c1 = arith.constant 1 : index
    %c0_44 = arith.constant 0 : index
    %c0_45 = arith.constant 0 : index
    %80 = vector.load %arg2[%c1, %c0_44, %c0_45] : memref<4x16x3xf32, #tpu.memory_space<vmem>>, vector<1x16x3xf32>
    %81 = vector.shape_cast %80 : vector<1x16x3xf32> to vector<16x3xf32>
    %82 = vector.extract_strided_slice %81 {offsets = [0, 0], sizes = [16, 1], strides = [1, 1]} : vector<16x3xf32> to vector<16x1xf32>
    %83 = vector.broadcast %82 : vector<16x1xf32> to vector<16x8xf32>
    %84 = vector.broadcast %7 : vector<1x8xf32> to vector<16x8xf32>
    %85 = arith.mulf %83, %84 : vector<16x8xf32>
    %86 = arith.addf %6, %85 : vector<16x8xf32>
    %87 = vector.extract_strided_slice %81 {offsets = [0, 2], sizes = [16, 1], strides = [1, 1]} : vector<16x3xf32> to vector<16x1xf32>
    %88 = vector.broadcast %87 : vector<16x1xf32> to vector<16x8xf32>
    %89 = vector.broadcast %8 : vector<1x8xf32> to vector<16x8xf32>
    %90 = arith.mulf %88, %89 : vector<16x8xf32>
    %91 = arith.addf %86, %90 : vector<16x8xf32>
    %cst_46 = arith.constant 0.000000e+00 : f32
    %92 = vector.broadcast %cst_46 : f32 to vector<16x8xf32>
    %93 = arith.maximumf %91, %92 : vector<16x8xf32>
    %94 = vector.extract_strided_slice %81 {offsets = [0, 1], sizes = [16, 1], strides = [1, 1]} : vector<16x3xf32> to vector<16x1xf32>
    %95 = arith.truncf %93 : vector<16x8xf32> to vector<16x8xbf16>
    %cst_47 = arith.constant dense<0.000000e+00> : vector<16x64xf32>
    %96 = tpu.matmul %95, %9, %cst_47 {dimension_numbers = #tpu.dot_dimension_numbers<[1], [0], [0], [1], [0, 0, 1, 1], [], []>} : vector<16x8xbf16>, vector<8x64xbf16>, vector<16x64xf32> -> vector<16x64xf32>
    %97 = arith.addf %2, %96 : vector<16x64xf32>
    %98 = vector.broadcast %10 : vector<1x64xf32> to vector<16x64xf32>
    %99 = arith.addf %97, %98 : vector<16x64xf32>
    %cst_48 = arith.constant 0.000000e+00 : f32
    %100 = vector.broadcast %cst_48 : f32 to vector<16x64xf32>
    %101 = arith.maximumf %99, %100 : vector<16x64xf32>
    %102 = arith.truncf %101 : vector<16x64xf32> to vector<16x64xbf16>
    %103 = vector.extract_strided_slice %102 {offsets = [0, 0], sizes = [16, 32], strides = [1, 1]} : vector<16x64xbf16> to vector<16x32xbf16>
    %cst_49 = arith.constant dense<0.000000e+00> : vector<16x32xf32>
    %104 = tpu.matmul %103, %11, %cst_49 {dimension_numbers = #tpu.dot_dimension_numbers<[1], [0], [0], [1], [0, 0, 1, 1], [], []>} : vector<16x32xbf16>, vector<32x32xbf16>, vector<16x32xf32> -> vector<16x32xf32>
    %105 = vector.broadcast %12 : vector<1x32xf32> to vector<16x32xf32>
    %106 = arith.addf %104, %105 : vector<16x32xf32>
    %cst_50 = arith.constant 0.000000e+00 : f32
    %107 = vector.broadcast %cst_50 : f32 to vector<16x32xf32>
    %108 = arith.maximumf %106, %107 : vector<16x32xf32>
    %109 = arith.truncf %108 : vector<16x32xf32> to vector<16x32xbf16>
    %110 = vector.extract_strided_slice %102 {offsets = [0, 32], sizes = [16, 32], strides = [1, 1]} : vector<16x64xbf16> to vector<16x32xbf16>
    %cst_51 = arith.constant dense<0.000000e+00> : vector<16x32xf32>
    %111 = tpu.matmul %110, %15, %cst_51 {dimension_numbers = #tpu.dot_dimension_numbers<[1], [0], [0], [1], [0, 0, 1, 1], [], []>} : vector<16x32xbf16>, vector<32x32xbf16>, vector<16x32xf32> -> vector<16x32xf32>
    %112 = vector.broadcast %16 : vector<1x32xf32> to vector<16x32xf32>
    %113 = arith.addf %111, %112 : vector<16x32xf32>
    %cst_52 = arith.constant 0.000000e+00 : f32
    %114 = vector.broadcast %cst_52 : f32 to vector<16x32xf32>
    %115 = arith.maximumf %113, %114 : vector<16x32xf32>
    %116 = arith.truncf %115 : vector<16x32xf32> to vector<16x32xbf16>
    %cst_53 = arith.constant dense<0.000000e+00> : vector<16x1xf32>
    %117 = tpu.matmul %109, %13, %cst_53 {dimension_numbers = #tpu.dot_dimension_numbers<[1], [0], [0], [1], [0, 0, 1, 1], [], []>} : vector<16x32xbf16>, vector<32x1xbf16>, vector<16x1xf32> -> vector<16x1xf32>
    %118 = vector.broadcast %14 : vector<1x1xf32> to vector<16x1xf32>
    %119 = arith.addf %117, %118 : vector<16x1xf32>
    %cst_54 = arith.constant -1.000000e+01 : f32
    %cst_55 = arith.constant 1.000000e+01 : f32
    %120 = vector.broadcast %cst_54 : f32 to vector<16x1xf32>
    %121 = arith.maximumf %120, %119 : vector<16x1xf32>
    %122 = vector.broadcast %cst_55 : f32 to vector<16x1xf32>
    %123 = arith.minimumf %122, %121 : vector<16x1xf32>
    %cst_56 = arith.constant dense<0.000000e+00> : vector<16x1xf32>
    %124 = tpu.matmul %116, %17, %cst_56 {dimension_numbers = #tpu.dot_dimension_numbers<[1], [0], [0], [1], [0, 0, 1, 1], [], []>} : vector<16x32xbf16>, vector<32x1xbf16>, vector<16x1xf32> -> vector<16x1xf32>
    %125 = vector.broadcast %18 : vector<1x1xf32> to vector<16x1xf32>
    %126 = arith.addf %124, %125 : vector<16x1xf32>
    %127 = math.exp %123 : vector<16x1xf32>
    %128 = arith.mulf %94, %127 : vector<16x1xf32>
    %129 = arith.addf %126, %128 : vector<16x1xf32>
    %c1_i32_57 = arith.constant 1 : i32
    %130 = vector.broadcast %c1_i32_57 : i32 to vector<1x3xi32>
    %131 = arith.cmpi eq, %19, %130 : vector<1x3xi32>
    %132 = vector.shape_cast %131 : vector<1x3xi1> to vector<1x3xi1>
    %133 = vector.broadcast %132 : vector<1x3xi1> to vector<16x3xi1>
    %134 = vector.shape_cast %129 : vector<16x1xf32> to vector<16x1xf32>
    %135 = vector.broadcast %134 : vector<16x1xf32> to vector<16x3xf32>
    %136 = arith.select %133, %135, %81 : vector<16x3xi1>, vector<16x3xf32>
    %c1_58 = arith.constant 1 : index
    %c0_59 = arith.constant 0 : index
    %c0_60 = arith.constant 0 : index
    %137 = vector.load %arg17[%c1_58, %c0_59, %c0_60] : memref<4x16x3xf32, #tpu.memory_space<vmem>>, vector<1x16x3xf32>
    %138 = vector.shape_cast %137 : vector<1x16x3xf32> to vector<16x3xf32>
    %139 = vector.shape_cast %136 : vector<16x3xf32> to vector<1x16x3xf32>
    tpu.vector_store %arg17[%c1_58, %c0_59, %c0_60], %139 {strides = array<i32>} : memref<4x16x3xf32, #tpu.memory_space<vmem>>, vector<1x16x3xf32>,
    %c2 = arith.constant 2 : index
    %c0_61 = arith.constant 0 : index
    %c0_62 = arith.constant 0 : index
    %140 = vector.load %arg2[%c2, %c0_61, %c0_62] : memref<4x16x3xf32, #tpu.memory_space<vmem>>, vector<1x16x3xf32>
    %141 = vector.shape_cast %140 : vector<1x16x3xf32> to vector<16x3xf32>
    %142 = vector.extract_strided_slice %141 {offsets = [0, 0], sizes = [16, 1], strides = [1, 1]} : vector<16x3xf32> to vector<16x1xf32>
    %143 = vector.broadcast %142 : vector<16x1xf32> to vector<16x8xf32>
    %144 = vector.broadcast %7 : vector<1x8xf32> to vector<16x8xf32>
    %145 = arith.mulf %143, %144 : vector<16x8xf32>
    %146 = arith.addf %6, %145 : vector<16x8xf32>
    %147 = vector.extract_strided_slice %141 {offsets = [0, 2], sizes = [16, 1], strides = [1, 1]} : vector<16x3xf32> to vector<16x1xf32>
    %148 = vector.broadcast %147 : vector<16x1xf32> to vector<16x8xf32>
    %149 = vector.broadcast %8 : vector<1x8xf32> to vector<16x8xf32>
    %150 = arith.mulf %148, %149 : vector<16x8xf32>
    %151 = arith.addf %146, %150 : vector<16x8xf32>
    %cst_63 = arith.constant 0.000000e+00 : f32
    %152 = vector.broadcast %cst_63 : f32 to vector<16x8xf32>
    %153 = arith.maximumf %151, %152 : vector<16x8xf32>
    %154 = vector.extract_strided_slice %141 {offsets = [0, 1], sizes = [16, 1], strides = [1, 1]} : vector<16x3xf32> to vector<16x1xf32>
    %155 = arith.truncf %153 : vector<16x8xf32> to vector<16x8xbf16>
    %cst_64 = arith.constant dense<0.000000e+00> : vector<16x64xf32>
    %156 = tpu.matmul %155, %9, %cst_64 {dimension_numbers = #tpu.dot_dimension_numbers<[1], [0], [0], [1], [0, 0, 1, 1], [], []>} : vector<16x8xbf16>, vector<8x64xbf16>, vector<16x64xf32> -> vector<16x64xf32>
    %157 = arith.addf %2, %156 : vector<16x64xf32>
    %158 = vector.broadcast %10 : vector<1x64xf32> to vector<16x64xf32>
    %159 = arith.addf %157, %158 : vector<16x64xf32>
    %cst_65 = arith.constant 0.000000e+00 : f32
    %160 = vector.broadcast %cst_65 : f32 to vector<16x64xf32>
    %161 = arith.maximumf %159, %160 : vector<16x64xf32>
    %162 = arith.truncf %161 : vector<16x64xf32> to vector<16x64xbf16>
    %163 = vector.extract_strided_slice %162 {offsets = [0, 0], sizes = [16, 32], strides = [1, 1]} : vector<16x64xbf16> to vector<16x32xbf16>
    %cst_66 = arith.constant dense<0.000000e+00> : vector<16x32xf32>
    %164 = tpu.matmul %163, %11, %cst_66 {dimension_numbers = #tpu.dot_dimension_numbers<[1], [0], [0], [1], [0, 0, 1, 1], [], []>} : vector<16x32xbf16>, vector<32x32xbf16>, vector<16x32xf32> -> vector<16x32xf32>
    %165 = vector.broadcast %12 : vector<1x32xf32> to vector<16x32xf32>
    %166 = arith.addf %164, %165 : vector<16x32xf32>
    %cst_67 = arith.constant 0.000000e+00 : f32
    %167 = vector.broadcast %cst_67 : f32 to vector<16x32xf32>
    %168 = arith.maximumf %166, %167 : vector<16x32xf32>
    %169 = arith.truncf %168 : vector<16x32xf32> to vector<16x32xbf16>
    %170 = vector.extract_strided_slice %162 {offsets = [0, 32], sizes = [16, 32], strides = [1, 1]} : vector<16x64xbf16> to vector<16x32xbf16>
    %cst_68 = arith.constant dense<0.000000e+00> : vector<16x32xf32>
    %171 = tpu.matmul %170, %15, %cst_68 {dimension_numbers = #tpu.dot_dimension_numbers<[1], [0], [0], [1], [0, 0, 1, 1], [], []>} : vector<16x32xbf16>, vector<32x32xbf16>, vector<16x32xf32> -> vector<16x32xf32>
    %172 = vector.broadcast %16 : vector<1x32xf32> to vector<16x32xf32>
    %173 = arith.addf %171, %172 : vector<16x32xf32>
    %cst_69 = arith.constant 0.000000e+00 : f32
    %174 = vector.broadcast %cst_69 : f32 to vector<16x32xf32>
    %175 = arith.maximumf %173, %174 : vector<16x32xf32>
    %176 = arith.truncf %175 : vector<16x32xf32> to vector<16x32xbf16>
    %cst_70 = arith.constant dense<0.000000e+00> : vector<16x1xf32>
    %177 = tpu.matmul %169, %13, %cst_70 {dimension_numbers = #tpu.dot_dimension_numbers<[1], [0], [0], [1], [0, 0, 1, 1], [], []>} : vector<16x32xbf16>, vector<32x1xbf16>, vector<16x1xf32> -> vector<16x1xf32>
    %178 = vector.broadcast %14 : vector<1x1xf32> to vector<16x1xf32>
    %179 = arith.addf %177, %178 : vector<16x1xf32>
    %cst_71 = arith.constant -1.000000e+01 : f32
    %cst_72 = arith.constant 1.000000e+01 : f32
    %180 = vector.broadcast %cst_71 : f32 to vector<16x1xf32>
    %181 = arith.maximumf %180, %179 : vector<16x1xf32>
    %182 = vector.broadcast %cst_72 : f32 to vector<16x1xf32>
    %183 = arith.minimumf %182, %181 : vector<16x1xf32>
    %cst_73 = arith.constant dense<0.000000e+00> : vector<16x1xf32>
    %184 = tpu.matmul %176, %17, %cst_73 {dimension_numbers = #tpu.dot_dimension_numbers<[1], [0], [0], [1], [0, 0, 1, 1], [], []>} : vector<16x32xbf16>, vector<32x1xbf16>, vector<16x1xf32> -> vector<16x1xf32>
    %185 = vector.broadcast %18 : vector<1x1xf32> to vector<16x1xf32>
    %186 = arith.addf %184, %185 : vector<16x1xf32>
    %187 = math.exp %183 : vector<16x1xf32>
    %188 = arith.mulf %154, %187 : vector<16x1xf32>
    %189 = arith.addf %186, %188 : vector<16x1xf32>
    %c1_i32_74 = arith.constant 1 : i32
    %190 = vector.broadcast %c1_i32_74 : i32 to vector<1x3xi32>
    %191 = arith.cmpi eq, %19, %190 : vector<1x3xi32>
    %192 = vector.shape_cast %191 : vector<1x3xi1> to vector<1x3xi1>
    %193 = vector.broadcast %192 : vector<1x3xi1> to vector<16x3xi1>
    %194 = vector.shape_cast %189 : vector<16x1xf32> to vector<16x1xf32>
    %195 = vector.broadcast %194 : vector<16x1xf32> to vector<16x3xf32>
    %196 = arith.select %193, %195, %141 : vector<16x3xi1>, vector<16x3xf32>
    %c2_75 = arith.constant 2 : index
    %c0_76 = arith.constant 0 : index
    %c0_77 = arith.constant 0 : index
    %197 = vector.load %arg17[%c2_75, %c0_76, %c0_77] : memref<4x16x3xf32, #tpu.memory_space<vmem>>, vector<1x16x3xf32>
    %198 = vector.shape_cast %197 : vector<1x16x3xf32> to vector<16x3xf32>
    %199 = vector.shape_cast %196 : vector<16x3xf32> to vector<1x16x3xf32>
    tpu.vector_store %arg17[%c2_75, %c0_76, %c0_77], %199 {strides = array<i32>} : memref<4x16x3xf32, #tpu.memory_space<vmem>>, vector<1x16x3xf32>,
    %c3 = arith.constant 3 : index
    %c0_78 = arith.constant 0 : index
    %c0_79 = arith.constant 0 : index
    %200 = vector.load %arg2[%c3, %c0_78, %c0_79] : memref<4x16x3xf32, #tpu.memory_space<vmem>>, vector<1x16x3xf32>
    %201 = vector.shape_cast %200 : vector<1x16x3xf32> to vector<16x3xf32>
    %202 = vector.extract_strided_slice %201 {offsets = [0, 0], sizes = [16, 1], strides = [1, 1]} : vector<16x3xf32> to vector<16x1xf32>
    %203 = vector.broadcast %202 : vector<16x1xf32> to vector<16x8xf32>
    %204 = vector.broadcast %7 : vector<1x8xf32> to vector<16x8xf32>
    %205 = arith.mulf %203, %204 : vector<16x8xf32>
    %206 = arith.addf %6, %205 : vector<16x8xf32>
    %207 = vector.extract_strided_slice %201 {offsets = [0, 2], sizes = [16, 1], strides = [1, 1]} : vector<16x3xf32> to vector<16x1xf32>
    %208 = vector.broadcast %207 : vector<16x1xf32> to vector<16x8xf32>
    %209 = vector.broadcast %8 : vector<1x8xf32> to vector<16x8xf32>
    %210 = arith.mulf %208, %209 : vector<16x8xf32>
    %211 = arith.addf %206, %210 : vector<16x8xf32>
    %cst_80 = arith.constant 0.000000e+00 : f32
    %212 = vector.broadcast %cst_80 : f32 to vector<16x8xf32>
    %213 = arith.maximumf %211, %212 : vector<16x8xf32>
    %214 = vector.extract_strided_slice %201 {offsets = [0, 1], sizes = [16, 1], strides = [1, 1]} : vector<16x3xf32> to vector<16x1xf32>
    %215 = arith.truncf %213 : vector<16x8xf32> to vector<16x8xbf16>
    %cst_81 = arith.constant dense<0.000000e+00> : vector<16x64xf32>
    %216 = tpu.matmul %215, %9, %cst_81 {dimension_numbers = #tpu.dot_dimension_numbers<[1], [0], [0], [1], [0, 0, 1, 1], [], []>} : vector<16x8xbf16>, vector<8x64xbf16>, vector<16x64xf32> -> vector<16x64xf32>
    %217 = arith.addf %2, %216 : vector<16x64xf32>
    %218 = vector.broadcast %10 : vector<1x64xf32> to vector<16x64xf32>
    %219 = arith.addf %217, %218 : vector<16x64xf32>
    %cst_82 = arith.constant 0.000000e+00 : f32
    %220 = vector.broadcast %cst_82 : f32 to vector<16x64xf32>
    %221 = arith.maximumf %219, %220 : vector<16x64xf32>
    %222 = arith.truncf %221 : vector<16x64xf32> to vector<16x64xbf16>
    %223 = vector.extract_strided_slice %222 {offsets = [0, 0], sizes = [16, 32], strides = [1, 1]} : vector<16x64xbf16> to vector<16x32xbf16>
    %cst_83 = arith.constant dense<0.000000e+00> : vector<16x32xf32>
    %224 = tpu.matmul %223, %11, %cst_83 {dimension_numbers = #tpu.dot_dimension_numbers<[1], [0], [0], [1], [0, 0, 1, 1], [], []>} : vector<16x32xbf16>, vector<32x32xbf16>, vector<16x32xf32> -> vector<16x32xf32>
    %225 = vector.broadcast %12 : vector<1x32xf32> to vector<16x32xf32>
    %226 = arith.addf %224, %225 : vector<16x32xf32>
    %cst_84 = arith.constant 0.000000e+00 : f32
    %227 = vector.broadcast %cst_84 : f32 to vector<16x32xf32>
    %228 = arith.maximumf %226, %227 : vector<16x32xf32>
    %229 = arith.truncf %228 : vector<16x32xf32> to vector<16x32xbf16>
    %230 = vector.extract_strided_slice %222 {offsets = [0, 32], sizes = [16, 32], strides = [1, 1]} : vector<16x64xbf16> to vector<16x32xbf16>
    %cst_85 = arith.constant dense<0.000000e+00> : vector<16x32xf32>
    %231 = tpu.matmul %230, %15, %cst_85 {dimension_numbers = #tpu.dot_dimension_numbers<[1], [0], [0], [1], [0, 0, 1, 1], [], []>} : vector<16x32xbf16>, vector<32x32xbf16>, vector<16x32xf32> -> vector<16x32xf32>
    %232 = vector.broadcast %16 : vector<1x32xf32> to vector<16x32xf32>
    %233 = arith.addf %231, %232 : vector<16x32xf32>
    %cst_86 = arith.constant 0.000000e+00 : f32
    %234 = vector.broadcast %cst_86 : f32 to vector<16x32xf32>
    %235 = arith.maximumf %233, %234 : vector<16x32xf32>
    %236 = arith.truncf %235 : vector<16x32xf32> to vector<16x32xbf16>
    %cst_87 = arith.constant dense<0.000000e+00> : vector<16x1xf32>
    %237 = tpu.matmul %229, %13, %cst_87 {dimension_numbers = #tpu.dot_dimension_numbers<[1], [0], [0], [1], [0, 0, 1, 1], [], []>} : vector<16x32xbf16>, vector<32x1xbf16>, vector<16x1xf32> -> vector<16x1xf32>
    %238 = vector.broadcast %14 : vector<1x1xf32> to vector<16x1xf32>
    %239 = arith.addf %237, %238 : vector<16x1xf32>
    %cst_88 = arith.constant -1.000000e+01 : f32
    %cst_89 = arith.constant 1.000000e+01 : f32
    %240 = vector.broadcast %cst_88 : f32 to vector<16x1xf32>
    %241 = arith.maximumf %240, %239 : vector<16x1xf32>
    %242 = vector.broadcast %cst_89 : f32 to vector<16x1xf32>
    %243 = arith.minimumf %242, %241 : vector<16x1xf32>
    %cst_90 = arith.constant dense<0.000000e+00> : vector<16x1xf32>
    %244 = tpu.matmul %236, %17, %cst_90 {dimension_numbers = #tpu.dot_dimension_numbers<[1], [0], [0], [1], [0, 0, 1, 1], [], []>} : vector<16x32xbf16>, vector<32x1xbf16>, vector<16x1xf32> -> vector<16x1xf32>
    %245 = vector.broadcast %18 : vector<1x1xf32> to vector<16x1xf32>
    %246 = arith.addf %244, %245 : vector<16x1xf32>
    %247 = math.exp %243 : vector<16x1xf32>
    %248 = arith.mulf %214, %247 : vector<16x1xf32>
    %249 = arith.addf %246, %248 : vector<16x1xf32>
    %c1_i32_91 = arith.constant 1 : i32
    %250 = vector.broadcast %c1_i32_91 : i32 to vector<1x3xi32>
    %251 = arith.cmpi eq, %19, %250 : vector<1x3xi32>
    %252 = vector.shape_cast %251 : vector<1x3xi1> to vector<1x3xi1>
    %253 = vector.broadcast %252 : vector<1x3xi1> to vector<16x3xi1>
    %254 = vector.shape_cast %249 : vector<16x1xf32> to vector<16x1xf32>
    %255 = vector.broadcast %254 : vector<16x1xf32> to vector<16x3xf32>
    %256 = arith.select %253, %255, %201 : vector<16x3xi1>, vector<16x3xf32>
    %c3_92 = arith.constant 3 : index
    %c0_93 = arith.constant 0 : index
    %c0_94 = arith.constant 0 : index
    %257 = vector.load %arg17[%c3_92, %c0_93, %c0_94] : memref<4x16x3xf32, #tpu.memory_space<vmem>>, vector<1x16x3xf32>
    %258 = vector.shape_cast %257 : vector<1x16x3xf32> to vector<16x3xf32>
    %259 = vector.shape_cast %256 : vector<16x3xf32> to vector<1x16x3xf32>
    tpu.vector_store %arg17[%c3_92, %c0_93, %c0_94], %259 {strides = array<i32>} : memref<4x16x3xf32, #tpu.memory_space<vmem>>, vector<1x16x3xf32>,
    return
  }
  func.func @transform_0(%arg0: i32, %arg1: i32) -> (i32, i32, i32) {
    %c0_i32 = arith.constant 0 : i32
    %c0_i32_0 = arith.constant 0 : i32
    return %arg1, %arg0, %c0_i32 : i32, i32, i32
  }
  func.func @transform_1(%arg0: i32, %arg1: i32) -> (i32, i32) {
    %c0_i32 = arith.constant 0 : i32
    %c0_i32_0 = arith.constant 0 : i32
    return %arg0, %c0_i32 : i32, i32
  }
  func.func @transform_2(%arg0: i32, %arg1: i32) -> (i32, i32) {
    %c0_i32 = arith.constant 0 : i32
    %c0_i32_0 = arith.constant 0 : i32
    %c0_i32_1 = arith.constant 0 : i32
    return %c0_i32, %c0_i32_0 : i32, i32
  }
  func.func @transform_3(%arg0: i32, %arg1: i32) -> (i32, i32) {
    %c0_i32 = arith.constant 0 : i32
    %c0_i32_0 = arith.constant 0 : i32
    %c0_i32_1 = arith.constant 0 : i32
    return %c0_i32, %c0_i32_0 : i32, i32
  }
  func.func @transform_4(%arg0: i32, %arg1: i32) -> (i32, i32) {
    %c0_i32 = arith.constant 0 : i32
    %c0_i32_0 = arith.constant 0 : i32
    %c0_i32_1 = arith.constant 0 : i32
    return %c0_i32, %c0_i32_0 : i32, i32
  }
  func.func @transform_5(%arg0: i32, %arg1: i32) -> (i32, i32) {
    %c0_i32 = arith.constant 0 : i32
    %c0_i32_0 = arith.constant 0 : i32
    %c0_i32_1 = arith.constant 0 : i32
    return %c0_i32, %c0_i32_0 : i32, i32
  }
  func.func @transform_6(%arg0: i32, %arg1: i32) -> (i32, i32) {
    %c0_i32 = arith.constant 0 : i32
    %c0_i32_0 = arith.constant 0 : i32
    %c0_i32_1 = arith.constant 0 : i32
    return %c0_i32, %c0_i32_0 : i32, i32
  }
  func.func @transform_7(%arg0: i32, %arg1: i32) -> (i32, i32) {
    %c0_i32 = arith.constant 0 : i32
    %c0_i32_0 = arith.constant 0 : i32
    %c0_i32_1 = arith.constant 0 : i32
    return %c0_i32, %c0_i32_0 : i32, i32
  }
  func.func @transform_8(%arg0: i32, %arg1: i32) -> (i32, i32) {
    %c0_i32 = arith.constant 0 : i32
    %c0_i32_0 = arith.constant 0 : i32
    %c0_i32_1 = arith.constant 0 : i32
    return %c0_i32, %c0_i32_0 : i32, i32
  }
  func.func @transform_9(%arg0: i32, %arg1: i32) -> (i32, i32) {
    %c0_i32 = arith.constant 0 : i32
    %c0_i32_0 = arith.constant 0 : i32
    %c0_i32_1 = arith.constant 0 : i32
    return %c0_i32, %c0_i32_0 : i32, i32
  }
  func.func @transform_10(%arg0: i32, %arg1: i32) -> (i32, i32) {
    %c0_i32 = arith.constant 0 : i32
    %c0_i32_0 = arith.constant 0 : i32
    %c0_i32_1 = arith.constant 0 : i32
    return %c0_i32, %c0_i32_0 : i32, i32
  }
  func.func @transform_11(%arg0: i32, %arg1: i32) -> (i32, i32) {
    %c0_i32 = arith.constant 0 : i32
    %c0_i32_0 = arith.constant 0 : i32
    %c0_i32_1 = arith.constant 0 : i32
    return %c0_i32, %c0_i32_0 : i32, i32
  }
  func.func @transform_12(%arg0: i32, %arg1: i32) -> (i32, i32) {
    %c0_i32 = arith.constant 0 : i32
    %c0_i32_0 = arith.constant 0 : i32
    %c0_i32_1 = arith.constant 0 : i32
    return %c0_i32, %c0_i32_0 : i32, i32
  }
  func.func @transform_13(%arg0: i32, %arg1: i32) -> (i32, i32) {
    %c0_i32 = arith.constant 0 : i32
    %c0_i32_0 = arith.constant 0 : i32
    %c0_i32_1 = arith.constant 0 : i32
    return %c0_i32, %c0_i32_0 : i32, i32
  }
  func.func @transform_14(%arg0: i32, %arg1: i32) -> (i32, i32) {
    %c0_i32 = arith.constant 0 : i32
    %c0_i32_0 = arith.constant 0 : i32
    %c0_i32_1 = arith.constant 0 : i32
    return %c0_i32, %c0_i32_0 : i32, i32
  }
  func.func @transform_15(%arg0: i32, %arg1: i32) -> (i32, i32, i32) {
    %c0_i32 = arith.constant 0 : i32
    %c0_i32_0 = arith.constant 0 : i32
    return %arg1, %arg0, %c0_i32 : i32, i32, i32
  }
}

</mosaic_0001>

<bundles_post_ra>
// kernel: tpu_custom_call.1
= control target key start
LH: loop header
LB: loop body
LE: loop exit
PB: predicated region body
PF: predicated region fallthrough
CT: control target
= control target key end

     0   :  { %v1812_v0 = vmov 2   ;;  %v1813_v1 = vmov 0   ;;  %v1814_v4 = vmov 0.0   ;;  %vm1815_vm0 = vmmov 0   ;;  %s1817_s22 = smov 1   ;;  %s1818_s23 = smov 127   ;;  %s2362_s0 = inlined_call_operand.vmem [shape: f32[4,16,3], index: 0, kind: input, shape index: {}]   ;;  %s2363_s4 = inlined_call_operand.vmem [shape: bf16[16,64], index: 4, kind: input, shape index: {}]   ;;  %s2364_s1 = inlined_call_operand.vmem [shape: bf16[16,16], index: 1, kind: input, shape index: {}]   ;;  %s2365_s5 = inlined_call_operand.vmem [shape: bf16[8,64], index: 5, kind: input, shape index: {}]   ;;  %s2366_s2 = inlined_call_operand.vmem [shape: f32[3,8], index: 2, kind: input, shape index: {}]   ;;  %s2367_s3 = inlined_call_operand.vmem [shape: f32[1,8], index: 3, kind: input, shape index: {}]   ;;  %s2368_s7 = inlined_call_operand.vmem [shape: bf16[32,32], index: 7, kind: input, shape index: {}]   ;;  %s2369_s11 = inlined_call_operand.vmem [shape: bf16[32,32], index: 11, kind: input, shape index: {}]   ;;  %s2370_s6 = inlined_call_operand.vmem [shape: f32[1,64], index: 6, kind: input, shape index: {}]   ;;  %s2371_s9 = inlined_call_operand.vmem [shape: bf16[32,1], index: 9, kind: input, shape index: {}]   ;;  %s2372_s13 = inlined_call_operand.vmem [shape: bf16[32,1], index: 13, kind: input, shape index: {}]   ;;  %s2373_s8 = inlined_call_operand.vmem [shape: f32[1,32], index: 8, kind: input, shape index: {}]   ;;  %s2374_s10 = inlined_call_operand.<no memory space> [shape: f32[1,1], index: 10, kind: input, shape index: {}]   ;;  %s2375_s14 = inlined_call_operand.<no memory space> [shape: f32[1,1], index: 14, kind: input, shape index: {}]   ;;  %s2376_s12 = inlined_call_operand.vmem [shape: f32[1,32], index: 12, kind: input, shape index: {}]   ;;  %s2377_s15 = inlined_call_operand.vmem [shape: f32[4,16,3], index: 15, kind: output, shape index: {}]  }
   0x1   :  { %1770 = vset.pattern.permute.xlu1 %v1812_v0  ;;  %1769 = vset.pattern.permute.xlu0 %v1813_v1  ;;  %v1904_v2 = vld [vmem:[%s2362_s0] sm:$0xff]  ;;  %v1911_v3 = vld [vmem:[%s2362_s0 + $0x8] sm:$0xff]  ;;  %vm70_vm1 = vcmask 130048   ;;  %v1928_v7 = vld [vmem:[%s2362_s0 + $0x10] sm:$0xff]  ;;  %vm190_vm2 = vcmask 1043456   ;;  %v145_v11 = vlaneseq  ;;  %vm186_vm3 = vcmask 64512  }
   0x2   :  { %168 = vperm.xlu1 %1770, %v1904_v2   ;;  %151 = vperm.xlu0 %1769, %v1904_v2   ;;  %v1782_v5 = vld [vmem:[%s2363_s4] sm:$0xff]   ;;  %v1939_v9 = vld [vmem:[%s2362_s0 + $0x18] sm:$0xff]  ;;  %v1985_v38 = vld [vmem:[%s2368_s7 + $0x8] sm:$0xff]   ;;  %vm266_vm4 = vcmask 261120   ;;  %v20_v62 = vstv %s2374_s10  ;;  %vm549_vm6 = vcmask 23552  }
   0x3   :  { %1604 = vmatprep.subr.bf16.mxu0 %v1814_v4  ;;  %1610 = vmatprep.subr.bf16.mxu1 %v1814_v4  ;;  %v1783_v6 = vld [vmem:[%s2364_s1] sm:$0xff]   ;;  %v160_v12 = vshrl.u32 %v145_v11, 7  ;;  %v1999_v40 = vld [vmem:[%s2369_s11 + $0x8] sm:$0xff]   ;;  %21 = vst [vmem:[#allocation2] sm:$0x1] %v20_v62 }
   0x4   :  { %1605 = vmatpush3.bf16.msra.mxu0 %v1782_v5  ;;  %1606 = vmatprep.mubr.msk.bf16.mxu0 %vm1815_vm0, %v1814_v4  ;;  %v123_v8 = vld [vmem:[%s2365_s5] sm:$0xf]  ;;  %v2026_v54 = vld [vmem:[%s2371_s9 + $0x8] sm:$0xff]  }
   0x5   :  { %1612 = vmatprep.mubr.msk.bf16.mxu1 %vm1815_vm0, %v1814_v4  ;;  %1616 = vmatprep.subr.bf16.mxu0 %v1814_v4  ;;  %v1941_v10 = vsel %vm190_vm2, %v123_v8, 0  ;;  %v161_v13 = vsub.s32 0, %v160_v12  ;;  %v115_v14 = vld [vmem:[%s2366_s2] sm:$0x7]  ;;  %v177_v15 = vsub.s32 2, %v160_v12  ;;  %v2043_v59 = vld [vmem:[%s2372_s13 + $0x8] sm:$0xff]  }
   0x6   :  { %172 = vperm.xlu1 %1770, %v1911_v3   ;;  %156 = vperm.xlu0 %1769, %v1911_v3   ;;  %v1967_v19 = vld [vmem:[%s2367_s3] ss:$0 sm:$0xff] }
   0x7   :  { %1607 = vmatmul.mubr.msk.bf16.vlgmr.msra.gmra.mxu0 %vm70_vm1, %v1783_v6  ;;  %1611 = vmatpush3.bf16.msra.mxu1 %v1941_v10  ;;  %v1960_v16 = vrot.slane %v115_v14, %v161_v13  ;;  %v1962_v17 = vrot.slane %v115_v14, %v177_v15  ;;  %v1992_v39 = vld [vmem:[%s2368_s7] sm:$0xff]  }
   0x8   :  { %1620 = vmatprep.mubr.msk.bf16.mxu0 %vm1815_vm0, %v1814_v4  ;;  %1624 = vmatprep.subr.bf16.mxu1 %v1814_v4  ;;  %v2005_v41 = vld [vmem:[%s2369_s11] sm:$0xff]   ;;  %s1816_s11 = smov 96  }
   0x9   :  { %1617 = vmatpush3.bf16.msra.mxu0 %v1985_v38  ;;  %v2014_v44 = vld [vmem:[%s2370_s6] ss:$0 sm:$0xff] }
   0xa   :  { %1771 = vset.pattern.permute.xlu1 %v1813_v1  ;;  %557 = vperm.xlu0 %1769, %v1928_v7   ;;  %v2033_v55 = vld [vmem:[%s2371_s9] sm:$0xff]  }
   0xb   :  { %562 = vperm.xlu1 %1771, %v1939_v9   ;;  %1618 = vmatprep.subr.bf16.mxu0 %v1814_v4  ;;  %v2050_v60 = vld [vmem:[%s2372_s13] sm:$0xff]  }
   0xc   :  { %v2060_v63 = vld [vmem:[%s2373_s8] ss:$0 sm:$0xff] }
   0xd   :  { %1619 = vmatpush3.bf16.msra.mxu0 %v1992_v39 }
   0xe   :  { %1772 = vset.pattern.permute.xlu0 %v1812_v0  ;;  %1632 = vmatprep.subr.bf16.mxu0 %v1814_v4 }
   0xf   :  { %1773 = vset.pattern.permute.xlu1 %v1812_v0  ;;  %570 = vperm.xlu0 %1772, %v1928_v7  }
  0x10   :  { %574 = vperm.xlu1 %1773, %v1939_v9  }
  0x13   :  { %1774 = vset.pattern.permute.xlu0 %v1813_v1 }
  0x14   :  { %1775 = vset.pattern.permute.xlu1 %v1813_v1 }
  0x7d   :  { %v169_v18 = vpop.permute.xlu1 %168  ;;  %v152_v20 = vpop.permute.xlu0 %151 }
  0x7e   :  { %v163_v21 = vmul.f32 %v1960_v16, %v152_v20  ;;  %v179_v22 = vmul.f32 %v1962_v17, %v169_v18 }
  0x80   :  { %v165_v23 = vadd.f32 %v1967_v19, %v163_v21 }
  0x81   :  { %v173_v24 = vpop.permute.xlu1 %172  ;;  %v157_v25 = vpop.permute.xlu0 %156 }
  0x82   :  { %v164_v26 = vmul.f32 %v1960_v16, %v157_v25  ;;  %v181_v27 = vadd.f32 %v179_v22, %v165_v23  ;;  %v180_v28 = vmul.f32 %v1962_v17, %v173_v24 }
  0x84   :  { %v166_v29 = vadd.f32 %v1967_v19, %v164_v26  ;;  %v183_v31 = vmax.f32 %v181_v27, 0.0 }
  0x85   :  { %v558_v61 = vpop.permute.xlu0 %557 }
  0x86   :  { %v182_v30 = vadd.f32 %v180_v28, %v166_v29  ;;  %v563_v56 = vpop.permute.xlu1 %562  ;;  %v565_v13 = vmul.f32 %v558_v61, %v1960_v16 }
  0x87   :  { %v566_v6 = vmul.f32 %v563_v56, %v1960_v16 }
  0x88   :  { %v184_v32 = vmax.f32 %v182_v30, 0.0  ;;  %v567_v24 = vadd.f32 %v1967_v19, %v565_v13 }
  0x89   :  { %v568_v18 = vadd.f32 %v1967_v19, %v566_v6 }
  0x8a   :  { %v185_v33 = vpack.c.bf16 %v184_v32, %v183_v31  ;;  %v571_v8 = vpop.permute.xlu0 %570 }
  0x8b   :  { %v575_v57 = vpop.permute.xlu1 %574  ;;  %v577_v20 = vmul.f32 %v571_v8, %v1962_v17 }
  0x8c   :  { %1613 = vmatmul.mubr.msk.bf16.vlgmr.msra.gmra.mxu1 %vm186_vm3, %v185_v33  ;;  %v578_v21 = vmul.f32 %v575_v57, %v1962_v17  ;;  %v2085_v33 = vld [vmem:[%s2362_s0 + $0x28] sm:$0xff] }
  0x8d   :  { %1628 = vmatprep.mubr.msk.bf16.mxu1 %vm1815_vm0, %v1814_v4  ;;  %1625 = vmatpush3.bf16.msra.mxu1 %v1999_v40  ;;  %v579_v27 = vadd.f32 %v577_v20, %v567_v24 }
  0x8e   :  { %1626 = vmatprep.subr.bf16.mxu1 %v1814_v4  ;;  %v580_v28 = vadd.f32 %v578_v21, %v568_v18 }
  0x8f   :  { %v581_v30 = vmax.f32 %v579_v27, 0.0 }
  0x90   :  { %v582_v31 = vmax.f32 %v580_v28, 0.0 }
  0x91   :  { %1627 = vmatpush3.bf16.msra.mxu1 %v2005_v41 }
  0x92   :  { %1640 = vmatprep.subr.bf16.mxu1 %v1814_v4  ;;  %v583_v32 = vpack.c.bf16 %v582_v31, %v581_v30 }
  0xc7   :  { %v1978_v34 = vpop.f32.mrf.mxu0 }
  0xc9   :  { %v1608_v35 = vpop.f32.mrf.mxu0 }
  0xca   :  { %v2092_v35 = vld [vmem:[%s2362_s0 + $0x20] sm:$0xff] }
  0xcb   :  { %v1980_v36 = vpop.f32.mrf.mxu0  ;;  %868 = vperm.xlu0 %1774, %v2092_v35  }
  0xcd   :  { %v1609_v37 = vpop.f32.mrf.mxu0 }
  0xce   :  { %v22_v37 = vstv %s2375_s14 }
  0xcf   :  { %1777 = vset.pattern.permute.xlu0 %v1812_v0  ;;  %23 = vst [vmem:[#allocation3] sm:$0x1] %v22_v37 }
  0xd0   :  { %885 = vperm.xlu0 %1777, %v2085_v33  }
  0xd4   :  { %1779 = vset.pattern.permute.xlu0 %v1813_v1 }
 0x146   :  { %v869_v28 = vpop.permute.xlu0 %868 }
 0x147   :  { %v876_v31 = vmul.f32 %v869_v28, %v1960_v16 }
 0x14b   :  { %v886_v37 = vpop.permute.xlu0 %885 }
 0x14c   :  { %v228_v42 = vpop.f32.mrf.mxu1 }
 0x14d   :  { %v235_v43 = vadd.f32 %v228_v42, %v1978_v34  ;;  %v2106_v42 = vld [vmem:[%s2376_s12] ss:$0 sm:$0xff] }
 0x14e   :  { %v1614_v45 = vpop.f32.mrf.mxu1 }
 0x14f   :  { %v243_v47 = vadd.f32 %v2014_v44, %v235_v43 }
 0x150   :  { %v231_v46 = vpop.f32.mrf.mxu1 }
 0x151   :  { %v236_v48 = vadd.f32 %v231_v46, %v1980_v36  ;;  %v245_v51 = vmax.f32 %v243_v47, 0.0 }
 0x152   :  { %v1615_v49 = vpop.f32.mrf.mxu1 }
 0x153   :  { %v244_v50 = vadd.f32 %v2014_v44, %v236_v48 }
 0x155   :  { %v246_v52 = vmax.f32 %v244_v50, 0.0 }
 0x157   :  { %v247_v53 = vpack.c.bf16 %v246_v52, %v245_v51 }
 0x159   :  { %321 = vrot.lane.b32.xlu1 %v247_v53, %s1816_s11  ;;  %1621 = vmatmul.mubr.msk.bf16.vlgmr.msra.gmra.mxu0 %vm266_vm4, %v247_v53 }
 0x15a   :  { %1636 = vmatprep.mubr.msk.bf16.mxu0 %vm1815_vm0, %v1814_v4  ;;  %1633 = vmatpush3.bf16.msra.mxu0 %v2026_v54 }
 0x15b   :  { %1634 = vmatprep.subr.bf16.mxu0 %v1814_v4 }
 0x15d   :  { %873 = vperm.xlu1 %1775, %v2085_v33  }
 0x15e   :  { %1635 = vmatpush3.bf16.msra.mxu0 %v2033_v55 }
 0x15f   :  { %1648 = vmatprep.subr.bf16.mxu0 %v1814_v4 }
 0x161   :  { %1776 = vset.pattern.permute.xlu1 %v1812_v0 }
 0x162   :  { %881 = vperm.xlu1 %1776, %v2092_v35  }
 0x166   :  { %1778 = vset.pattern.permute.xlu1 %v1813_v1 }
 0x1cb   :  { %v322_v58 = vpop.permute.xlu1 %321 }
 0x1cc   :  { %1629 = vmatmul.mubr.msk.bf16.vlgmr.msra.gmra.mxu1 %vm266_vm4, %v322_v58 }
 0x1cd   :  { %1644 = vmatprep.mubr.msk.bf16.mxu1 %vm1815_vm0, %v1814_v4  ;;  %1641 = vmatpush3.bf16.msra.mxu1 %v2043_v59 }
 0x1ce   :  { %1642 = vmatprep.subr.bf16.mxu1 %v1814_v4 }
 0x1d1   :  { %1643 = vmatpush3.bf16.msra.mxu1 %v2050_v60 }
 0x1d2   :  { %1654 = vmatprep.subr.bf16.mxu1 %v1814_v4 }
 0x219   :  { %v304_v5 = vpop.f32.mrf.mxu0 }
 0x21a   :  { %v305_v14 = vadd.f32 %v2060_v63, %v304_v5 }
 0x21b   :  { %v1622_v12 = vpop.f32.mrf.mxu0 }
 0x21c   :  { %v311_v25 = vmax.f32 %v305_v14, 0.0 }
 0x21d   :  { %v307_v15 = vpop.f32.mrf.mxu0 }
 0x21e   :  { %v308_v22 = vadd.f32 %v2060_v63, %v307_v15 }
 0x21f   :  { %v1623_v23 = vpop.f32.mrf.mxu0 }
 0x220   :  { %v312_v26 = vmax.f32 %v308_v22, 0.0 }
 0x222   :  { %v313_v29 = vpack.c.bf16 %v312_v26, %v311_v25  ;;  %v874_v25 = vpop.permute.xlu1 %873 }
 0x224   :  { %1637 = vmatmul.mubr.msk.bf16.vlgmr.msra.gmra.mxu0 %vm266_vm4, %v313_v29  ;;  %v877_v29 = vmul.f32 %v874_v25, %v1960_v16 }
 0x225   :  { %1649 = vmatpush3.bf16.msra.mxu0 %v1941_v10  ;;  %1650 = vmatprep.mubr.msk.bf16.mxu0 %vm1815_vm0, %v1814_v4 }
 0x226   :  { %1662 = vmatprep.subr.bf16.mxu0 %v1814_v4  ;;  %v882_v26 = vpop.permute.xlu1 %881 }
 0x22c   :  { %1651 = vmatmul.mubr.msk.bf16.vlgmr.msra.gmra.mxu0 %vm186_vm3, %v583_v32 }
 0x22d   :  { %1663 = vmatpush3.bf16.msra.mxu0 %v1999_v40  ;;  %1666 = vmatprep.mubr.msk.bf16.mxu0 %vm1815_vm0, %v1814_v4 }
 0x22e   :  { %1664 = vmatprep.subr.bf16.mxu0 %v1814_v4 }
 0x231   :  { %1665 = vmatpush3.bf16.msra.mxu0 %v2005_v41 }
 0x232   :  { %1678 = vmatprep.subr.bf16.mxu0 %v1814_v4 }
 0x28c   :  { %v372_v43 = vpop.f32.mrf.mxu1 }
 0x28d   :  { %v373_v46 = vadd.f32 %v2106_v42, %v372_v43 }
 0x28e   :  { %v1630_v45 = vpop.f32.mrf.mxu1 }
 0x28f   :  { %v379_v50 = vmax.f32 %v373_v46, 0.0  ;;  %v879_v45 = vadd.f32 %v1967_v19, %v877_v29 }
 0x290   :  { %v375_v47 = vpop.f32.mrf.mxu1 }
 0x291   :  { %v376_v48 = vadd.f32 %v2106_v42, %v375_v47  ;;  %v888_v47 = vmul.f32 %v882_v26, %v1962_v17 }
 0x292   :  { %v1631_v49 = vpop.f32.mrf.mxu1 }
 0x293   :  { %v380_v51 = vmax.f32 %v376_v48, 0.0  ;;  %v878_v48 = vadd.f32 %v1967_v19, %v876_v31 }
 0x295   :  { %v381_v52 = vpack.c.bf16 %v380_v51, %v379_v50  ;;  %v889_v50 = vmul.f32 %v886_v37, %v1962_v17 }
 0x297   :  { %1645 = vmatmul.mubr.msk.bf16.vlgmr.msra.gmra.mxu1 %vm266_vm4, %v381_v52 }
 0x298   :  { %1655 = vmatpush3.bf16.msra.mxu1 %v1985_v38  ;;  %1658 = vmatprep.mubr.msk.bf16.mxu1 %vm1815_vm0, %v1814_v4 }
 0x299   :  { %1656 = vmatprep.subr.bf16.mxu1 %v1814_v4 }
 0x29c   :  { %1657 = vmatpush3.bf16.msra.mxu1 %v1992_v39 }
 0x29d   :  { %1670 = vmatprep.subr.bf16.mxu1 %v1814_v4 }
 0x2e4   :  { %v2117_v53 = vpop.f32.mrf.mxu0 }
 0x2e6   :  { %v1638_v56 = vpop.f32.mrf.mxu0 }
 0x2e8   :  { %v2119_v57 = vpop.f32.mrf.mxu0 }
 0x2ea   :  { %v1639_v58 = vpop.f32.mrf.mxu0 }
 0x2eb   :  { %v890_v58 = vadd.f32 %v888_v47, %v878_v48 }
 0x2ec   :  { %v621_v61 = vpop.f32.mrf.mxu0 }
 0x2ed   :  { %v628_v62 = vadd.f32 %v621_v61, %v1978_v34 }
 0x2ee   :  { %v1652_v5 = vpop.f32.mrf.mxu0 }
 0x2ef   :  { %v630_v8 = vadd.f32 %v2014_v44, %v628_v62  ;;  %v891_v62 = vadd.f32 %v889_v50, %v879_v45  ;;  %v892_v5 = vmax.f32 %v890_v58, 0.0 }
 0x2f0   :  { %v624_v6 = vpop.f32.mrf.mxu0 }
 0x2f1   :  { %v629_v12 = vadd.f32 %v624_v6, %v1980_v36  ;;  %v632_v15 = vmax.f32 %v630_v8, 0.0  ;;  %v893_v6 = vmax.f32 %v891_v62, 0.0 }
 0x2f2   :  { %v1653_v13 = vpop.f32.mrf.mxu0 }
 0x2f3   :  { %v631_v14 = vadd.f32 %v2014_v44, %v629_v12  ;;  %v894_v8 = vpack.c.bf16 %v893_v6, %v892_v5  ;;  %v2167_v12 = vld [vmem:[%s2362_s0 + $0x38] sm:$0xff]  ;;  %v2173_v13 = vld [vmem:[%s2362_s0 + $0x30] sm:$0xff] }
 0x2f4   :  { %1184 = vperm.xlu0 %1779, %v2167_v12  }
 0x2f5   :  { %v633_v18 = vmax.f32 %v631_v14, 0.0 }
 0x2f7   :  { %v634_v20 = vpack.c.bf16 %v633_v18, %v632_v15 }
 0x2f9   :  { %683 = vrot.lane.b32.xlu1 %v634_v20, %s1816_s11  ;;  %1659 = vmatmul.mubr.msk.bf16.vlgmr.msra.gmra.mxu1 %vm266_vm4, %v634_v20 }
 0x2fa   :  { %1671 = vmatpush3.bf16.msra.mxu1 %v2026_v54  ;;  %1674 = vmatprep.mubr.msk.bf16.mxu1 %vm1815_vm0, %v1814_v4 }
 0x2fb   :  { %1672 = vmatprep.subr.bf16.mxu1 %v1814_v4 }
 0x2fd   :  { %1179 = vperm.xlu1 %1778, %v2173_v13  }
 0x2fe   :  { %1673 = vmatpush3.bf16.msra.mxu1 %v2033_v55 }
 0x2ff   :  { %1686 = vmatprep.subr.bf16.mxu1 %v1814_v4 }
 0x301   :  { %1780 = vset.pattern.permute.xlu1 %v1812_v0  ;;  %v2189_v0 = vld [vmem:[#allocation2] ss:$0 sm:$0xff] }
 0x302   :  { %1192 = vperm.xlu1 %1780, %v2173_v13  }
 0x306   :  { %1196 = vperm.xlu1 %1780, %v2167_v12  }
 0x30a   :  { %1781 = vset.pattern.permute.xlu1 %v1813_v1  ;;  %v438_v1 = vadd.f32 %v2189_v0, %v2117_v53 }
 0x357   :  { %v2133_v21 = vpop.f32.mrf.mxu1 }
 0x359   :  { %v1646_v22 = vpop.f32.mrf.mxu1 }
 0x35b   :  { %v2135_v23 = vpop.f32.mrf.mxu1 }
 0x35d   :  { %v1647_v24 = vpop.f32.mrf.mxu1 }
 0x36b   :  { %v684_v27 = vpop.permute.xlu1 %683 }
 0x36c   :  { %1667 = vmatmul.mubr.msk.bf16.vlgmr.msra.gmra.mxu0 %vm266_vm4, %v684_v27 }
 0x36d   :  { %1679 = vmatpush3.bf16.msra.mxu0 %v2043_v59  ;;  %1682 = vmatprep.mubr.msk.bf16.mxu0 %vm1815_vm0, %v1814_v4 }
 0x36e   :  { %1680 = vmatprep.subr.bf16.mxu0 %v1814_v4 }
 0x371   :  { %1681 = vmatpush3.bf16.msra.mxu0 %v2050_v60 }
 0x372   :  { %1692 = vmatprep.subr.bf16.mxu0 %v1814_v4 }
 0x3b9   :  { %v672_v30 = vpop.f32.mrf.mxu1 }
 0x3ba   :  { %v673_v43 = vadd.f32 %v2060_v63, %v672_v30  ;;  %v1507_v30 = vclamps-f32 %v438_v1, 10.0 }
 0x3bb   :  { %v1660_v32 = vpop.f32.mrf.mxu1 }
 0x3bc   :  { %v679_v52 = vmax.f32 %v673_v43, 0.0  ;;  %v510_v43 = vmul.f32 1.442695, %v1507_v30 }
 0x3bd   :  { %v675_v46 = vpop.f32.mrf.mxu1 }
 0x3be   :  { %v676_v49 = vadd.f32 %v2060_v63, %v675_v46  ;;  %1792 = vpow2.f32 %v510_v43 }
 0x3bf   :  { %v1661_v51 = vpop.f32.mrf.mxu1 }
 0x3c0   :  { %v680_v56 = vmax.f32 %v676_v49, 0.0 }
 0x3c2   :  { %v681_v61 = vpack.c.bf16 %v680_v56, %v679_v52 }
 0x3c4   :  { %1675 = vmatmul.mubr.msk.bf16.vlgmr.msra.gmra.mxu1 %vm266_vm4, %v681_v61 }
 0x3c5   :  { %1687 = vmatpush3.bf16.msra.mxu1 %v1941_v10  ;;  %1688 = vmatprep.mubr.msk.bf16.mxu1 %vm1815_vm0, %v1814_v4 }
 0x3c6   :  { %1700 = vmatprep.subr.bf16.mxu1 %v1814_v4 }
 0x3cb   :  { %v1793_v5 = vpop.eup %1792 }
 0x3cc   :  { %1689 = vmatmul.mubr.msk.bf16.vlgmr.msra.gmra.mxu1 %vm186_vm3, %v894_v8 }
 0x3cd   :  { %1701 = vmatpush3.bf16.msra.mxu1 %v1999_v40  ;;  %1704 = vmatprep.mubr.msk.bf16.mxu1 %vm1815_vm0, %v1814_v4 }
 0x3ce   :  { %1702 = vmatprep.subr.bf16.mxu1 %v1814_v4 }
 0x3d1   :  { %1703 = vmatpush3.bf16.msra.mxu1 %v2005_v41 }
 0x3d2   :  { %1716 = vmatprep.subr.bf16.mxu1 %v1814_v4 }
 0x42c   :  { %v722_v14 = vpop.f32.mrf.mxu0 }
 0x42d   :  { %v723_v18 = vadd.f32 %v2106_v42, %v722_v14 }
 0x42e   :  { %v1668_v15 = vpop.f32.mrf.mxu0 }
 0x42f   :  { %v729_v25 = vmax.f32 %v723_v18, 0.0 }
 0x430   :  { %v725_v20 = vpop.f32.mrf.mxu0 }
 0x431   :  { %v726_v22 = vadd.f32 %v2106_v42, %v725_v20  ;;  %v1185_v20 = vpop.permute.xlu0 %1184 }
 0x432   :  { %v1669_v24 = vpop.f32.mrf.mxu0 }
 0x433   :  { %v730_v26 = vmax.f32 %v726_v22, 0.0  ;;  %v1180_v24 = vpop.permute.xlu1 %1179 }
 0x434   :  { %v1187_v1 = vmul.f32 %v1180_v24, %v1960_v16 }
 0x435   :  { %v731_v27 = vpack.c.bf16 %v730_v26, %v729_v25  ;;  %v1188_v26 = vmul.f32 %v1185_v20, %v1960_v16 }
 0x436   :  { %v1189_v43 = vadd.f32 %v1967_v19, %v1187_v1 }
 0x437   :  { %1683 = vmatmul.mubr.msk.bf16.vlgmr.msra.gmra.mxu0 %vm266_vm4, %v731_v27  ;;  %v1193_v25 = vpop.permute.xlu1 %1192 }
 0x438   :  { %1693 = vmatpush3.bf16.msra.mxu0 %v1985_v38  ;;  %1696 = vmatprep.mubr.msk.bf16.mxu0 %vm1815_vm0, %v1814_v4 }
 0x439   :  { %1694 = vmatprep.subr.bf16.mxu0 %v1814_v4 }
 0x43c   :  { %1695 = vmatpush3.bf16.msra.mxu0 %v1992_v39 }
 0x43d   :  { %1708 = vmatprep.subr.bf16.mxu0 %v1814_v4 }
 0x484   :  { %v769_v28 = vpop.f32.mrf.mxu1 }
 0x485   :  { %v770_v31 = vadd.f32 %v2189_v0, %v769_v28 }
 0x486   :  { %v1676_v29 = vpop.f32.mrf.mxu1 }
 0x487   :  { %v1519_v45 = vclamps-f32 %v770_v31, 10.0  ;;  %v1197_v29 = vpop.permute.xlu1 %1196  ;;  %v1190_v31 = vadd.f32 %v1967_v19, %v1188_v26 }
 0x488   :  { %v2194_v32 = vpop.f32.mrf.mxu1 }
 0x489   :  { %v824_v49 = vmul.f32 1.442695, %v1519_v45  ;;  %v1199_v45 = vmul.f32 %v1193_v25, %v1962_v17 }
 0x48a   :  { %v1677_v37 = vpop.f32.mrf.mxu1 }
 0x48b   :  { %1794 = vpow2.f32 %v824_v49 }
 0x48c   :  { %v932_v46 = vpop.f32.mrf.mxu1 }
 0x48d   :  { %v939_v47 = vadd.f32 %v932_v46, %v1978_v34  ;;  %v1200_v46 = vmul.f32 %v1197_v29, %v1962_v17 }
 0x48e   :  { %v1690_v48 = vpop.f32.mrf.mxu1 }
 0x48f   :  { %v941_v51 = vadd.f32 %v2014_v44, %v939_v47  ;;  %v1202_v16 = vadd.f32 %v1200_v46, %v1190_v31 }
 0x490   :  { %v935_v50 = vpop.f32.mrf.mxu1 }
 0x491   :  { %v940_v53 = vadd.f32 %v935_v50, %v1980_v36  ;;  %v943_v58 = vmax.f32 %v941_v51, 0.0  ;;  %v1201_v51 = vadd.f32 %v1199_v45, %v1189_v43 }
 0x492   :  { %v1691_v52 = vpop.f32.mrf.mxu1 }
 0x493   :  { %v942_v56 = vadd.f32 %v2014_v44, %v940_v53  ;;  %v1203_v19 = vmax.f32 %v1201_v51, 0.0  ;;  %v1204_v52 = vmax.f32 %v1202_v16, 0.0 }
 0x495   :  { %v944_v61 = vmax.f32 %v942_v56, 0.0  ;;  %v1205_v17 = vpack.c.bf16 %v1204_v52, %v1203_v19 }
 0x497   :  { %v945_v62 = vpack.c.bf16 %v944_v61, %v943_v58 }
 0x498   :  { %v1795_v6 = vpop.eup %1794 }
 0x499   :  { %994 = vrot.lane.b32.xlu0 %v945_v62, %s1816_s11  ;;  %1697 = vmatmul.mubr.msk.bf16.vlgmr.msra.gmra.mxu0 %vm266_vm4, %v945_v62 }
 0x49a   :  { %1709 = vmatpush3.bf16.msra.mxu0 %v2026_v54  ;;  %1712 = vmatprep.mubr.msk.bf16.mxu0 %vm1815_vm0, %v1814_v4 }
 0x49b   :  { %1710 = vmatprep.subr.bf16.mxu0 %v1814_v4 }
 0x49d   :  { %516 = vrot.lane.b32.xlu0 %v1793_v5, %s1817_s22 }
 0x49e   :  { %1711 = vmatpush3.bf16.msra.mxu0 %v2033_v55 }
 0x49f   :  { %1724 = vmatprep.subr.bf16.mxu0 %v1814_v4 }
 0x4a1   :  { %830 = vrot.lane.b32.xlu0 %v1795_v6, %s1817_s22 }
 0x4f7   :  { %v2210_v8 = vpop.f32.mrf.mxu0 }
 0x4f9   :  { %v1684_v14 = vpop.f32.mrf.mxu0 }
 0x4fb   :  { %v2212_v15 = vpop.f32.mrf.mxu0 }
 0x4fd   :  { %v1685_v18 = vpop.f32.mrf.mxu0 }
 0x50b   :  { %v995_v22 = vpop.permute.xlu0 %994 }
 0x50c   :  { %1705 = vmatmul.mubr.msk.bf16.vlgmr.msra.gmra.mxu1 %vm266_vm4, %v995_v22 }
 0x50d   :  { %1717 = vmatpush3.bf16.msra.mxu1 %v2043_v59  ;;  %1720 = vmatprep.mubr.msk.bf16.mxu1 %vm1815_vm0, %v1814_v4 }
 0x50e   :  { %1718 = vmatprep.subr.bf16.mxu1 %v1814_v4 }
 0x511   :  { %1719 = vmatpush3.bf16.msra.mxu1 %v2050_v60 }
 0x512   :  { %1730 = vmatprep.subr.bf16.mxu1 %v1814_v4 }
 0x559   :  { %v983_v27 = vpop.f32.mrf.mxu0 }
 0x55a   :  { %v984_v30 = vadd.f32 %v2060_v63, %v983_v27 }
 0x55b   :  { %v1698_v28 = vpop.f32.mrf.mxu0 }
 0x55c   :  { %v990_v49 = vmax.f32 %v984_v30, 0.0 }
 0x55d   :  { %v986_v37 = vpop.f32.mrf.mxu0 }
 0x55e   :  { %v987_v47 = vadd.f32 %v2060_v63, %v986_v37 }
 0x55f   :  { %v1699_v48 = vpop.f32.mrf.mxu0 }
 0x560   :  { %v991_v50 = vmax.f32 %v987_v47, 0.0 }
 0x562   :  { %v992_v53 = vpack.c.bf16 %v991_v50, %v990_v49 }
 0x564   :  { %1713 = vmatmul.mubr.msk.bf16.vlgmr.msra.gmra.mxu0 %vm266_vm4, %v992_v53 }
 0x565   :  { %1725 = vmatpush3.bf16.msra.mxu0 %v1941_v10  ;;  %1726 = vmatprep.mubr.msk.bf16.mxu0 %vm1815_vm0, %v1814_v4 }
 0x566   :  { %1738 = vmatprep.subr.bf16.mxu0 %v1814_v4 }
 0x56c   :  { %1727 = vmatmul.mubr.msk.bf16.vlgmr.msra.gmra.mxu0 %vm186_vm3, %v1205_v17 }
 0x56d   :  { %1739 = vmatpush3.bf16.msra.mxu0 %v1999_v40  ;;  %1742 = vmatprep.mubr.msk.bf16.mxu0 %vm1815_vm0, %v1814_v4 }
 0x56e   :  { %1740 = vmatprep.subr.bf16.mxu0 %v1814_v4 }
 0x571   :  { %1741 = vmatpush3.bf16.msra.mxu0 %v2005_v41  ;;  %v441_v41 = vadd.f32 %v2189_v0, %v2119_v57 }
 0x572   :  { %1754 = vmatprep.subr.bf16.mxu0 %v1814_v4 }
 0x573   :  { %v1508_v24 = vclamps-f32 %v441_v41, 10.0 }
 0x575   :  { %v512_v28 = vmul.f32 1.442695, %v1508_v24 }
 0x5cc   :  { %v1033_v10 = vpop.f32.mrf.mxu1 }
 0x5cd   :  { %v1034_v58 = vadd.f32 %v2106_v42, %v1033_v10 }
 0x5ce   :  { %v1706_v56 = vpop.f32.mrf.mxu1 }
 0x5cf   :  { %v1040_v6 = vmax.f32 %v1034_v58, 0.0 }
 0x5d0   :  { %v1036_v61 = vpop.f32.mrf.mxu1 }
 0x5d1   :  { %v1037_v62 = vadd.f32 %v2106_v42, %v1036_v61 }
 0x5d2   :  { %v1707_v5 = vpop.f32.mrf.mxu1 }
 0x5d3   :  { %v1041_v14 = vmax.f32 %v1037_v62, 0.0 }
 0x5d5   :  { %v1042_v40 = vpack.c.bf16 %v1041_v14, %v1040_v6 }
 0x5d7   :  { %1721 = vmatmul.mubr.msk.bf16.vlgmr.msra.gmra.mxu1 %vm266_vm4, %v1042_v40 }
 0x5d8   :  { %1731 = vmatpush3.bf16.msra.mxu1 %v1985_v38  ;;  %1734 = vmatprep.mubr.msk.bf16.mxu1 %vm1815_vm0, %v1814_v4  ;;  %v773_v38 = vadd.f32 %v2189_v0, %v2194_v32 }
 0x5d9   :  { %1732 = vmatprep.subr.bf16.mxu1 %v1814_v4 }
 0x5da   :  { %v1520_v29 = vclamps-f32 %v773_v38, 10.0 }
 0x5dc   :  { %1733 = vmatpush3.bf16.msra.mxu1 %v1992_v39  ;;  %v826_v37 = vmul.f32 1.442695, %v1520_v29 }
 0x5dd   :  { %1746 = vmatprep.subr.bf16.mxu1 %v1814_v4 }
 0x624   :  { %v1080_v18 = vpop.f32.mrf.mxu0 }
 0x625   :  { %v1081_v20 = vadd.f32 %v2189_v0, %v1080_v18 }
 0x626   :  { %v1714_v22 = vpop.f32.mrf.mxu0 }
 0x627   :  { %v1530_v25 = vclamps-f32 %v1081_v20, 10.0 }
 0x628   :  { %v1083_v26 = vpop.f32.mrf.mxu0 }
 0x629   :  { %v1135_v27 = vmul.f32 1.442695, %v1530_v25  ;;  %v1084_v39 = vadd.f32 %v2189_v0, %v1083_v26 }
 0x62a   :  { %v1715_v1 = vpop.f32.mrf.mxu0 }
 0x62b   :  { %1796 = vpow2.f32 %v1135_v27  ;;  %v1531_v43 = vclamps-f32 %v1084_v39, 10.0 }
 0x62c   :  { %v1243_v30 = vpop.f32.mrf.mxu0  ;;  %1798 = vpow2.f32 %v512_v28 }
 0x62d   :  { %v1250_v57 = vadd.f32 %v1243_v30, %v1978_v34  ;;  %1800 = vpow2.f32 %v826_v37  ;;  %v1137_v48 = vmul.f32 1.442695, %v1531_v43 }
 0x62e   :  { %v1728_v31 = vpop.f32.mrf.mxu0 }
 0x62f   :  { %v1252_v46 = vadd.f32 %v2014_v44, %v1250_v57  ;;  %1802 = vpow2.f32 %v1137_v48 }
 0x630   :  { %v1246_v45 = vpop.f32.mrf.mxu0 }
 0x631   :  { %v1251_v32 = vadd.f32 %v1246_v45, %v1980_v36  ;;  %v1254_v50 = vmax.f32 %v1252_v46, 0.0 }
 0x632   :  { %v1729_v47 = vpop.f32.mrf.mxu0 }
 0x633   :  { %v1253_v49 = vadd.f32 %v2014_v44, %v1251_v32 }
 0x635   :  { %v1255_v51 = vmax.f32 %v1253_v49, 0.0 }
 0x637   :  { %v1256_v16 = vpack.c.bf16 %v1255_v51, %v1254_v50 }
 0x638   :  { %v1797_v53 = vpop.eup %1796 }
 0x639   :  { %1141 = vrot.lane.b32.xlu0 %v1797_v53, %s1817_s22  ;;  %1305 = vrot.lane.b32.xlu1 %v1256_v16, %s1816_s11  ;;  %v1799_v34 = vpop.eup %1798 }
 0x63a   :  { %1735 = vmatmul.mubr.msk.bf16.vlgmr.msra.gmra.mxu1 %vm266_vm4, %v1256_v16  ;;  %v1801_v36 = vpop.eup %1800 }
 0x63b   :  { %1747 = vmatpush3.bf16.msra.mxu1 %v2026_v54  ;;  %1750 = vmatprep.mubr.msk.bf16.mxu1 %vm1815_vm0, %v1814_v4 }
 0x63c   :  { %1748 = vmatprep.subr.bf16.mxu1 %v1814_v4  ;;  %v1803_v44 = vpop.eup %1802 }
 0x63d   :  { %518 = vrot.lane.b32.xlu1 %v1799_v34, %s1817_s22 }
 0x63f   :  { %1749 = vmatpush3.bf16.msra.mxu1 %v2033_v55 }
 0x641   :  { %832 = vrot.lane.b32.xlu1 %v1801_v36, %s1817_s22 }
 0x645   :  { %1143 = vrot.lane.b32.xlu1 %v1803_v44, %s1817_s22 }
 0x697   :  { %v2271_v19 = vpop.f32.mrf.mxu1 }
 0x699   :  { %v1722_v52 = vpop.f32.mrf.mxu1 }
 0x69b   :  { %v2273_v54 = vpop.f32.mrf.mxu1 }
 0x69d   :  { %v1723_v17 = vpop.f32.mrf.mxu1 }
 0x6ab   :  { %v1306_v10 = vpop.permute.xlu1 %1305 }
 0x6ac   :  { %1743 = vmatmul.mubr.msk.bf16.vlgmr.msra.gmra.mxu0 %vm266_vm4, %v1306_v10 }
 0x6ad   :  { %1755 = vmatpush3.bf16.msra.mxu0 %v2043_v59  ;;  %1758 = vmatprep.mubr.msk.bf16.mxu0 %vm1815_vm0, %v1814_v4 }
 0x6ae   :  { %1756 = vmatprep.subr.bf16.mxu0 %v1814_v4 }
 0x6af   :  { %v519_v37 = vpop.permute.xlu1 %518 }
 0x6b0   :  { %v523_v47 = vmul.f32 %v519_v37, %v1911_v3 }
 0x6b1   :  { %1757 = vmatpush3.bf16.msra.mxu0 %v2050_v60 }
 0x6b3   :  { %v833_v32 = vpop.permute.xlu1 %832 }
 0x6b4   :  { %v837_v50 = vmul.f32 %v1939_v9, %v833_v32 }
 0x6b7   :  { %v1144_v51 = vpop.permute.xlu1 %1143 }
 0x6fa   :  { %v1294_v55 = vpop.f32.mrf.mxu1 }
 0x6fb   :  { %v1295_v58 = vadd.f32 %v2060_v63, %v1294_v55 }
 0x6fc   :  { %v1736_v56 = vpop.f32.mrf.mxu1 }
 0x6fd   :  { %v1301_v6 = vmax.f32 %v1295_v58, 0.0 }
 0x6fe   :  { %v1297_v61 = vpop.f32.mrf.mxu1 }
 0x6ff   :  { %v1298_v62 = vadd.f32 %v2060_v63, %v1297_v61 }
 0x700   :  { %v1737_v5 = vpop.f32.mrf.mxu1 }
 0x701   :  { %v1302_v14 = vmax.f32 %v1298_v62, 0.0 }
 0x703   :  { %v1303_v40 = vpack.c.bf16 %v1302_v14, %v1301_v6 }
 0x705   :  { %1751 = vmatmul.mubr.msk.bf16.vlgmr.msra.gmra.mxu1 %vm266_vm4, %v1303_v40 }
 0x76c   :  { %v1344_v59 = vpop.f32.mrf.mxu0 }
 0x76d   :  { %v1345_v18 = vadd.f32 %v2106_v42, %v1344_v59 }
 0x76e   :  { %v1744_v41 = vpop.f32.mrf.mxu0 }
 0x76f   :  { %v1351_v22 = vmax.f32 %v1345_v18, 0.0 }
 0x770   :  { %v1347_v4 = vpop.f32.mrf.mxu0 }
 0x771   :  { %v1348_v60 = vadd.f32 %v2106_v42, %v1347_v4  ;;  %v517_v42 = vpop.permute.xlu0 %516 }
 0x772   :  { %v1745_v20 = vpop.f32.mrf.mxu0  ;;  %v522_v43 = vmul.f32 %v517_v42, %v1904_v2  ;;  %v1148_v2 = vmul.f32 %v2085_v33, %v1144_v51 }
 0x773   :  { %v1352_v24 = vmax.f32 %v1348_v60, 0.0 }
 0x775   :  { %v1353_v38 = vpack.c.bf16 %v1352_v24, %v1351_v22  ;;  %v831_v46 = vpop.permute.xlu0 %830 }
 0x777   :  { %1759 = vmatmul.mubr.msk.bf16.vlgmr.msra.gmra.mxu0 %vm266_vm4, %v1353_v38  ;;  %v146_v38 = vand.u32 127, %v145_v11  ;;  %v1809_v11 = vld [vmem:[%s2362_s0 + $0x8] sm:$0xff] }
 0x779   :  { %v1142_v48 = vpop.permute.xlu0 %1141  ;;  %vm534_vm5 = vcmp.eq.s32.totalorder %v146_v38, 1 }
 0x77a   :  { %v1147_v49 = vmul.f32 %v2092_v35, %v1142_v48 }
 0x7c5   :  { %v1391_v63 = vpop.f32.mrf.mxu1 }
 0x7c6   :  { %v1392_v25 = vadd.f32 %v2189_v0, %v1391_v63 }
 0x7c7   :  { %v1752_v26 = vpop.f32.mrf.mxu1 }
 0x7c8   :  { %v1541_v27 = vclamps-f32 %v1392_v25, 10.0 }
 0x7c9   :  { %v1394_v1 = vpop.f32.mrf.mxu1 }
 0x7ca   :  { %v1446_v28 = vmul.f32 1.442695, %v1541_v27  ;;  %v1395_v29 = vadd.f32 %v2189_v0, %v1394_v1  ;;  %v836_v0 = vmul.f32 %v1928_v7, %v831_v46  ;;  %v1509_v7 = vld [vmem:[#allocation3] ss:$0 sm:$0xff] }
 0x7cb   :  { %v1753_v39 = vpop.f32.mrf.mxu1  ;;  %v504_v52 = vadd.f32 %v1509_v7, %v2133_v21  ;;  %v507_v56 = vadd.f32 %v1509_v7, %v2135_v23  ;;  %v818_v58 = vadd.f32 %v1509_v7, %v2210_v8  ;;  %v821_v14 = vadd.f32 %v1509_v7, %v2212_v15 }
 0x7cc   :  { %1804 = vpow2.f32 %v1446_v28  ;;  %v1542_v30 = vclamps-f32 %v1395_v29, 10.0  ;;  %v1129_v21 = vadd.f32 %v1509_v7, %v2271_v19  ;;  %v1132_v23 = vadd.f32 %v1509_v7, %v2273_v54  ;;  %v1808_v54 = vld [vmem:[%s2362_s0] sm:$0xff]  ;;  %v1810_v28 = vld [vmem:[%s2362_s0 + $0x10] sm:$0xff] }
 0x7ce   :  { %v1448_v57 = vmul.f32 1.442695, %v1542_v30 }
 0x7d0   :  { %1806 = vpow2.f32 %v1448_v57  ;;  %v1811_v57 = vld [vmem:[%s2362_s0 + $0x18] sm:$0xff] }
 0x7d9   :  { %v1805_v31 = vpop.eup %1804 }
 0x7da   :  { %1452 = vrot.lane.b32.xlu0 %v1805_v31, %s1817_s22 }
 0x7dd   :  { %v1807_v45 = vpop.eup %1806 }
 0x7de   :  { %1454 = vrot.lane.b32.xlu1 %v1807_v45, %s1817_s22  ;;  %526 = vrot.lane.b32.xlu0 %v522_v43, %s1818_s23 }
 0x7e2   :  { %528 = vrot.lane.b32.xlu1 %v523_v47, %s1818_s23  ;;  %840 = vrot.lane.b32.xlu0 %v836_v0, %s1818_s23 }
 0x7e6   :  { %842 = vrot.lane.b32.xlu1 %v837_v50, %s1818_s23  ;;  %1151 = vrot.lane.b32.xlu0 %v1147_v49, %s1818_s23 }
 0x7ea   :  { %1153 = vrot.lane.b32.xlu1 %v1148_v2, %s1818_s23 }
 0x837   :  { %v1439_v16 = vpop.f32.mrf.mxu0 }
 0x838   :  { %v1440_v60 = vadd.f32 %v1509_v7, %v1439_v16 }
 0x839   :  { %v1760_v53 = vpop.f32.mrf.mxu0 }
 0x83b   :  { %v1442_v34 = vpop.f32.mrf.mxu0 }
 0x83c   :  { %v1443_v24 = vadd.f32 %v1509_v7, %v1442_v34 }
 0x83d   :  { %v1761_v36 = vpop.f32.mrf.mxu0 }
 0x84c   :  { %v1453_v44 = vpop.permute.xlu0 %1452 }
 0x84d   :  { %v1458_v3 = vmul.f32 %v2173_v13, %v1453_v44 }
 0x84f   :  { %1462 = vrot.lane.b32.xlu0 %v1458_v3, %s1818_s23 }
 0x850   :  { %v1455_v17 = vpop.permute.xlu1 %1454  ;;  %v527_v10 = vpop.permute.xlu0 %526 }
 0x851   :  { %v1459_v9 = vmul.f32 %v2167_v12, %v1455_v17  ;;  %v532_v55 = vadd.f32 %v527_v10, %v504_v52 }
 0x853   :  { %1464 = vrot.lane.b32.xlu1 %v1459_v9, %s1818_s23  ;;  %539 = vperm.xlu0 %1779, %v532_v55  }
 0x854   :  { %v529_v61 = vpop.permute.xlu1 %528  ;;  %v841_v62 = vpop.permute.xlu0 %840 }
 0x855   :  { %v533_v5 = vadd.f32 %v529_v61, %v507_v56  ;;  %v846_v6 = vadd.f32 %v841_v62, %v818_v58 }
 0x857   :  { %544 = vperm.xlu1 %1781, %v533_v5   ;;  %850 = vperm.xlu0 %1779, %v846_v6  }
 0x858   :  { %v843_v40 = vpop.permute.xlu1 %842  ;;  %v1152_v59 = vpop.permute.xlu0 %1151 }
 0x859   :  { %v847_v41 = vadd.f32 %v843_v40, %v821_v14  ;;  %v1157_v18 = vadd.f32 %v1152_v59, %v1129_v21 }
 0x85b   :  { %855 = vperm.xlu1 %1781, %v847_v41   ;;  %1161 = vperm.xlu0 %1779, %v1157_v18  }
 0x85c   :  { %v1154_v8 = vpop.permute.xlu1 %1153 }
 0x85d   :  { %v1158_v4 = vadd.f32 %v1154_v8, %v1132_v23 }
 0x85f   :  { %1166 = vperm.xlu1 %1781, %v1158_v4  }
 0x8c1   :  { %v1463_v20 = vpop.permute.xlu0 %1462 }
 0x8c2   :  { %v1468_v22 = vadd.f32 %v1463_v20, %v1440_v60 }
 0x8c4   :  { %1472 = vperm.xlu0 %1779, %v1468_v22  }
 0x8c5   :  { %v1465_v15 = vpop.permute.xlu1 %1464 }
 0x8c6   :  { %v1469_v19 = vadd.f32 %v1465_v15, %v1443_v24 }
 0x8c8   :  { %1477 = vperm.xlu1 %1781, %v1469_v19  }
 0x8ce   :  { %v540_v63 = vpop.permute.xlu0 %539 }
 0x8cf   :  { %v547_v25 = vsel %vm534_vm5, %v540_v63, %v1808_v54 }
 0x8d0   :  { %550 = vst.msk [vmem:[%s2377_s15] sm:$0xff] %vm549_vm6, %v547_v25 }
 0x8d2   :  { %v545_v26 = vpop.permute.xlu1 %544  ;;  %v851_v27 = vpop.permute.xlu0 %850 }
 0x8d3   :  { %v548_v1 = vsel %vm534_vm5, %v545_v26, %v1809_v11  ;;  %v858_v29 = vsel %vm534_vm5, %v851_v27, %v1810_v28 }
 0x8d4   :  { %551 = vst.msk [vmem:[%s2377_s15 + $0x8] sm:$0xff] %vm549_vm6, %v548_v1  ;;  %1522 = vst.msk [vmem:[%s2377_s15 + $0x10] sm:$0xff] %vm549_vm6, %v858_v29 }
 0x8d6   :  { %v856_v39 = vpop.permute.xlu1 %855  ;;  %v1162_v30 = vpop.permute.xlu0 %1161 }
 0x8d7   :  { %v859_v42 = vsel %vm534_vm5, %v856_v39, %v1811_v57  ;;  %v1169_v31 = vsel %vm534_vm5, %v1162_v30, %v2092_v35 }
 0x8d8   :  { %1523 = vst.msk [vmem:[%s2377_s15 + $0x18] sm:$0xff] %vm549_vm6, %v859_v42  ;;  %1533 = vst.msk [vmem:[%s2377_s15 + $0x20] sm:$0xff] %vm549_vm6, %v1169_v31 }
 0x8da   :  { %v1167_v37 = vpop.permute.xlu1 %1166 }
 0x8db   :  { %v1170_v43 = vsel %vm534_vm5, %v1167_v37, %v2085_v33 }
 0x8dc   :  { %1534 = vst.msk [vmem:[%s2377_s15 + $0x28] sm:$0xff] %vm549_vm6, %v1170_v43 }
 0x93f   :  { %v1473_v35 = vpop.permute.xlu0 %1472 }
 0x940   :  { %v1480_v45 = vsel %vm534_vm5, %v1473_v35, %v2173_v13 }
 0x941   :  { %1544 = vst.msk [vmem:[%s2377_s15 + $0x30] sm:$0xff] %vm549_vm6, %v1480_v45 }
 0x943   :  { %v1478_v46 = vpop.permute.xlu1 %1477 }
 0x944   :  { %v1481_v32 = vsel %vm534_vm5, %v1478_v46, %v2167_v12 }
 0x945   :  { %1545 = vst.msk [vmem:[%s2377_s15 + $0x38] sm:$0xff] %vm549_vm6, %v1481_v32 }

</bundles_post_ra>
